<compile_context>
chip_gen: v7x
topology: tpu7x:2x2x1
jax: 0.10.0
libtpu: 0.0.40
codegen_flags: <defaults>
</compile_context>

<pallas_src>
import functools

import jax
import jax.numpy as jnp
from jax import lax
from jax.experimental import pallas as pl
from jax.experimental.pallas import tpu as pltpu


def _round_up(x, m):
    return ((x + m - 1) // m) * m


def _la_head_kernel(x_ref, w_ref, b_ref, o_ref,
                    sum_ref, sumsq_ref, shift_ref,
                    *, d_model, chunk, n_chunks, unroll,
                    l_true, pad_rows, inv_l, inv_lm1):
    """Shapes:
      x_ref:     (Bt, Lt, D)       streamed activation tile
      w_ref:     (2*D, Op)         resident fused [W_mean; W_std]
      b_ref:     (1, Op)           resident bias
      o_ref:     (Bt, Op)          output (written on the last L tile)
      sum_ref:   (Bt, CH, D) f32   running sum of shifted x
      sumsq_ref: (Bt, CH, D) f32   running sum of shifted x^2
      shift_ref: (Bt, D)     f32   per-(batch, feature) shift (first row of x)
    """
    l = pl.program_id(1)

    @pl.when(l == 0)
    def _init():
        # Shift by the first sequence element: keeps the one-pass variance
        # numerically stable even when |mean| >> std.
        first = x_ref[:, pl.ds(0, 1), :].astype(jnp.float32)   # (Bt, 1, D)
        shift_ref[...] = first[:, 0, :]
        sum_ref[...] = jnp.zeros_like(sum_ref)
        sumsq_ref[...] = jnp.zeros_like(sumsq_ref)

    # Hoist the broadcast out of the chunk loop (once per grid step).
    shift = jnp.broadcast_to(shift_ref[...][:, None, :], sum_ref.shape)

    def body(c, carry):
        start = pl.multiple_of(c * chunk, chunk)
        y = x_ref[:, pl.ds(start, chunk), :].astype(jnp.float32) - shift
        sum_ref[...] += y            # pure VPU adds; bounded f32 temporaries
        sumsq_ref[...] += y * y
        return carry

    lax.fori_loop(0, n_chunks, body, 0, unroll=unroll)

    @pl.when(l == pl.num_programs(1) - 1)
    def _finalize():
        c = shift_ref[...]                                # (Bt, D)
        s = jnp.sum(sum_ref[...], axis=1)                 # sum over all padded rows of (x - c)
        q = jnp.sum(sumsq_ref[...], axis=1)               # ... of (x - c)^2
        # Remove the zero rows used to pad L: each contributed (-c) and c^2.
        s = s + pad_rows * c
        q = q - pad_rows * (c * c)
        mean_c = s * inv_l                                # mean - c
        mean = mean_c + c
        # Unbiased variance: [sum (x-c)^2 - L*(mean-c)^2] / (L-1).
        var = (q - l_true * (mean_c * mean_c)) * inv_lm1
        std = jnp.sqrt(jnp.maximum(var, 0.0))             # NaN when L == 1, like torch

        # [mean, std] @ W.T + b  ==  mean @ W[:D] + std @ W[D:] + b
        wm = w_ref[pl.ds(0, d_model), :]                  # (D, Op) static view
        ws = w_ref[pl.ds(d_model, d_model), :]            # (D, Op)
        o = (jnp.dot(mean.astype(wm.dtype), wm, preferred_element_type=jnp.float32)
             + jnp.dot(std.astype(ws.dtype), ws, preferred_element_type=jnp.float32)
             + b_ref[...].astype(jnp.float32))
        o_ref[...] = o.astype(o_ref.dtype)


def _choose_tiles(B, L, D, elem_bytes, budget_bytes):
    # Rows processed per inner-loop step: 8 for f32, 16 for bf16, 32 for 8-bit
    # so packed vregs stay full.
    chunk = max(8, 32 // max(1, elem_bytes))
    # Small batch tile: each strided HBM segment is l_tile*D*elem contiguous
    # bytes, and grid[0] >= 2 whenever B > 8 (both v7x TensorCores get work).
    b_tile = 8
    # L tile: as large as the per-buffer VMEM budget allows, multiple of chunk,
    # never larger than (L rounded up to the chunk).
    rows = max(chunk, budget_bytes // max(1, b_tile * D * elem_bytes))
    l_tile = max(chunk, min((rows // chunk) * chunk, _round_up(L, chunk)))
    return b_tile, l_tile, chunk


def t5_encoder_la_head(x, weight, bias, *, x_block_budget_bytes=4 << 20):
    """x: (B, L, D). weight: (out_dim, 2*D) as in nn.Linear. bias: (out_dim,)."""
    B, L, D = x.shape
    out_dim = weight.shape[0]
    assert weight.shape == (out_dim, 2 * D)

    # Lane-dense output: pad out_dim to a multiple of 128; fused resident weight.
    o_pad = _round_up(out_dim, 128)
    w_fused = jnp.zeros((2 * D, o_pad), weight.dtype).at[:, :out_dim].set(weight.T)
    b2d = jnp.zeros((1, o_pad), bias.dtype).at[0, :out_dim].set(bias)

    elem = x.dtype.itemsize
    b_tile, l_tile, chunk = _choose_tiles(B, L, D, elem, x_block_budget_bytes)

    # Zero-pad B and L; padded rows contribute nothing (corrected in finalize).
    b_padded = _round_up(B, b_tile)
    l_padded = _round_up(L, l_tile)
    if b_padded != B or l_padded != L:
        x = jnp.pad(x, ((0, b_padded - B), (0, l_padded - L), (0, 0)))

    grid = (b_padded // b_tile, l_padded // l_tile)
    n_chunks = l_tile // chunk

    inv_l = 1.0 / L
    # torch.std(correction=1) with L == 1 yields NaN; we intentionally match it.
    inv_lm1 = (1.0 / (L - 1)) if L > 1 else float("nan")

    kernel = functools.partial(
        _la_head_kernel,
        d_model=D, chunk=chunk, n_chunks=n_chunks, unroll=(n_chunks <= 8),
        l_true=float(L), pad_rows=float(l_padded - L),
        inv_l=inv_l, inv_lm1=inv_lm1)

    # ---- VMEM accounting: blocks, resident operands, scratch, in-kernel temps.
    x_block_bytes = b_tile * l_tile * D * elem
    w_bytes = 2 * D * o_pad * w_fused.dtype.itemsize
    bias_bytes = 8 * o_pad * b2d.dtype.itemsize
    out_bytes = b_tile * o_pad * x.dtype.itemsize
    scratch_bytes = (2 * b_tile * chunk * D + b_tile * max(D, 128)) * 4
    temp_bytes = 4 * b_tile * chunk * D * 4          # per-chunk f32 temporaries
    vmem_need = (2 * x_block_bytes + 2 * w_bytes + 2 * bias_bytes + 2 * out_bytes
                 + scratch_bytes + temp_bytes + (2 << 20))

    try:
        capacity = int(pltpu.get_tpu_info().vmem_capacity_bytes)
    except Exception:
        capacity = 64 << 20                          # conservative (v7x per-TC VMEM)
    vmem_limit = int(min(max(vmem_need, 32 << 20), capacity - (8 << 20)))
    vmem_limit = max(vmem_limit, 16 << 20)

    cost = pl.CostEstimate(
        flops=int(5 * b_padded * l_padded * D + 4 * b_padded * D * o_pad),
        transcendentals=0,
        bytes_accessed=int(b_padded * l_padded * D * elem + w_bytes + bias_bytes
                           + b_padded * o_pad * x.dtype.itemsize),
    )

    def run(single_buffer_resident):
        def resident_spec(shape):
            if single_buffer_resident:
                return pl.BlockSpec(shape, lambda b, l: (0, 0),
                                    pipeline_mode=pl.Buffered(1))
            return pl.BlockSpec(shape, lambda b, l: (0, 0))

        return pl.pallas_call(
            kernel,
            out_shape=jax.ShapeDtypeStruct((b_padded, o_pad), x.dtype),
            grid_spec=pltpu.PrefetchScalarGridSpec(
                num_scalar_prefetch=0,
                grid=grid,
                in_specs=[
                    pl.BlockSpec((b_tile, l_tile, D), lambda b, l: (b, l, 0)),  # streamed x
                    resident_spec((2 * D, o_pad)),                              # fused weights
                    resident_spec((1, o_pad)),                                  # bias
                ],
                out_specs=pl.BlockSpec((b_tile, o_pad), lambda b, l: (b, 0)),   # written on last l
                scratch_shapes=[
                    pltpu.VMEM((b_tile, chunk, D), jnp.float32),  # running sum (shifted)
                    pltpu.VMEM((b_tile, chunk, D), jnp.float32),  # running sum of squares
                    pltpu.VMEM((b_tile, D), jnp.float32),         # per-feature shift
                ],
            ),
            compiler_params=pltpu.CompilerParams(
                dimension_semantics=("parallel", "arbitrary"),
                vmem_limit_bytes=vmem_limit,
            ),
            cost_estimate=cost,
        )(x, w_fused, b2d)

    try:
        out_padded = run(True)    # single-buffered resident weights/bias
    except Exception:
        # Fallback if pl.Buffered(1) is unsupported by this jax/Mosaic version.
        out_padded = run(False)

    return out_padded[:B, :out_dim]


def _reference(x, weight, bias):
    mean = jnp.mean(x, axis=1)
    std = jnp.std(x, axis=1, ddof=1)
    pooled = jnp.concatenate([mean, std], axis=1)
    return pooled @ weight.T + bias


if __name__ == "__main__":
    # Small shapes consistent with the module: d_model=32, seq=8, batch=2, out_dim=16.
    B, L, D, OUT = 2, 8, 32, 16

    key = jax.random.PRNGKey(0)
    kx, kw, kb = jax.random.split(key, 3)
    x = jax.random.normal(kx, (B, L, D), dtype=jnp.float32)
    weight = jax.random.normal(kw, (OUT, 2 * D), dtype=jnp.float32) * 0.05
    bias = jax.random.normal(kb, (OUT,), dtype=jnp.float32) * 0.01

    out = jax.block_until_ready(t5_encoder_la_head(x, weight, bias))

    ref = _reference(x, weight, bias)
    assert out.shape == (B, OUT)
    assert jnp.allclose(out, ref, atol=1e-4, rtol=1e-4), "mismatch vs reference"

    print("KERNEL_OK")
</pallas_src>

<mosaic_0001>
module attributes {stable_mosaic.version = 11 : i64} {
  func.func @_la_head_kernel(%arg0: i32, %arg1: i32, %arg2: memref<8x8x32xf32, #tpu.memory_space<vmem>>, %arg3: memref<64x128xf32, #tpu.memory_space<vmem>>, %arg4: memref<1x128xf32, #tpu.memory_space<vmem>>, %arg5: memref<8x128xf32, #tpu.memory_space<vmem>>, %arg6: memref<8x8x32xf32, #tpu.memory_space<vmem>>, %arg7: memref<8x8x32xf32, #tpu.memory_space<vmem>>, %arg8: memref<8x32xf32, #tpu.memory_space<vmem>>) attributes {dimension_semantics = [#tpu.dimension_semantics<parallel>, #tpu.dimension_semantics<arbitrary>], iteration_bounds = array<i64: 1, 1>, scalar_prefetch = 0 : i64, scratch_operands = 3 : i64, tpu.core_type = #tpu.core_type<tc>, window_params = [{transform_indices = @transform_0, window_bounds = array<i64: 8, 8, 32>}, {pipeline_mode = #tpu.pipeline_mode<synchronous>, transform_indices = @transform_1, window_bounds = array<i64: 64, 128>}, {pipeline_mode = #tpu.pipeline_mode<synchronous>, transform_indices = @transform_2, window_bounds = array<i64: 1, 128>}, {transform_indices = @transform_3, window_bounds = array<i64: 8, 128>}]} {
    %c0_i32 = arith.constant 0 : i32
    %0 = arith.cmpi eq, %arg1, %c0_i32 : i32
    %1 = arith.extui %0 : i1 to i32
    %c0_i32_0 = arith.constant 0 : i32
    %2 = arith.cmpi ne, %1, %c0_i32_0 : i32
    scf.if %2 {
      %c0_19 = arith.constant 0 : index
      %c0_20 = arith.constant 0 : index
      %c0_21 = arith.constant 0 : index
      %22 = vector.load %arg2[%c0_19, %c0_20, %c0_21] : memref<8x8x32xf32, #tpu.memory_space<vmem>>, vector<8x1x32xf32>
      %23 = vector.shape_cast %22 : vector<8x1x32xf32> to vector<8x32xf32>
      %c0_22 = arith.constant 0 : index
      %c0_23 = arith.constant 0 : index
      %24 = vector.load %arg8[%c0_22, %c0_23] : memref<8x32xf32, #tpu.memory_space<vmem>>, vector<8x32xf32>
      tpu.vector_store %arg8[%c0_22, %c0_23], %23 {strides = array<i32>} : memref<8x32xf32, #tpu.memory_space<vmem>>, vector<8x32xf32>,
      %cst = arith.constant 0.000000e+00 : f32
      %25 = vector.broadcast %cst : f32 to vector<8x8x32xf32>
      %c0_24 = arith.constant 0 : index
      %c0_25 = arith.constant 0 : index
      %c0_26 = arith.constant 0 : index
      %26 = vector.load %arg6[%c0_24, %c0_25, %c0_26] : memref<8x8x32xf32, #tpu.memory_space<vmem>>, vector<8x8x32xf32>
      tpu.vector_store %arg6[%c0_24, %c0_25, %c0_26], %25 {strides = array<i32>} : memref<8x8x32xf32, #tpu.memory_space<vmem>>, vector<8x8x32xf32>,
      %cst_27 = arith.constant 0.000000e+00 : f32
      %27 = vector.broadcast %cst_27 : f32 to vector<8x8x32xf32>
      %c0_28 = arith.constant 0 : index
      %c0_29 = arith.constant 0 : index
      %c0_30 = arith.constant 0 : index
      %28 = vector.load %arg7[%c0_28, %c0_29, %c0_30] : memref<8x8x32xf32, #tpu.memory_space<vmem>>, vector<8x8x32xf32>
      tpu.vector_store %arg7[%c0_28, %c0_29, %c0_30], %27 {strides = array<i32>} : memref<8x8x32xf32, #tpu.memory_space<vmem>>, vector<8x8x32xf32>,
    } else {
    }
    %c0 = arith.constant 0 : index
    %c0_1 = arith.constant 0 : index
    %3 = vector.load %arg8[%c0, %c0_1] : memref<8x32xf32, #tpu.memory_space<vmem>>, vector<8x32xf32>
    %4 = vector.shape_cast %3 : vector<8x32xf32> to vector<8x1x32xf32>
    %5 = vector.shape_cast %4 : vector<8x1x32xf32> to vector<8x1x32xf32>
    %6 = vector.broadcast %5 : vector<8x1x32xf32> to vector<8x8x32xf32>
    %c0_i32_2 = arith.constant 0 : i32
    %c8_i32 = arith.constant 8 : i32
    %7 = arith.muli %c0_i32_2, %c8_i32 : i32
    %8 = tpu.assume_multiple %7, 8 : i32
    %c0_3 = arith.constant 0 : index
    %9 = arith.index_cast %8 : i32 to index
    %c0_4 = arith.constant 0 : index
    %10 = vector.load %arg2[%c0_3, %9, %c0_4] : memref<8x8x32xf32, #tpu.memory_space<vmem>>, vector<8x8x32xf32>
    %11 = arith.subf %10, %6 : vector<8x8x32xf32>
    %c0_5 = arith.constant 0 : index
    %c0_6 = arith.constant 0 : index
    %c0_7 = arith.constant 0 : index
    %12 = vector.load %arg6[%c0_5, %c0_6, %c0_7] : memref<8x8x32xf32, #tpu.memory_space<vmem>>, vector<8x8x32xf32>
    %13 = arith.addf %12, %11 : vector<8x8x32xf32>
    %c0_8 = arith.constant 0 : index
    %c0_9 = arith.constant 0 : index
    %c0_10 = arith.constant 0 : index
    %14 = vector.load %arg6[%c0_8, %c0_9, %c0_10] : memref<8x8x32xf32, #tpu.memory_space<vmem>>, vector<8x8x32xf32>
    tpu.vector_store %arg6[%c0_8, %c0_9, %c0_10], %13 {strides = array<i32>} : memref<8x8x32xf32, #tpu.memory_space<vmem>>, vector<8x8x32xf32>,
    %c0_11 = arith.constant 0 : index
    %c0_12 = arith.constant 0 : index
    %c0_13 = arith.constant 0 : index
    %15 = vector.load %arg7[%c0_11, %c0_12, %c0_13] : memref<8x8x32xf32, #tpu.memory_space<vmem>>, vector<8x8x32xf32>
    %16 = arith.mulf %11, %11 : vector<8x8x32xf32>
    %17 = arith.addf %15, %16 : vector<8x8x32xf32>
    %c0_14 = arith.constant 0 : index
    %c0_15 = arith.constant 0 : index
    %c0_16 = arith.constant 0 : index
    %18 = vector.load %arg7[%c0_14, %c0_15, %c0_16] : memref<8x8x32xf32, #tpu.memory_space<vmem>>, vector<8x8x32xf32>
    tpu.vector_store %arg7[%c0_14, %c0_15, %c0_16], %17 {strides = array<i32>} : memref<8x8x32xf32, #tpu.memory_space<vmem>>, vector<8x8x32xf32>,
    %c1_i32 = arith.constant 1 : i32
    %c0_i32_17 = arith.constant 0 : i32
    %19 = arith.cmpi eq, %arg1, %c0_i32_17 : i32
    %20 = arith.extui %19 : i1 to i32
    %c0_i32_18 = arith.constant 0 : i32
    %21 = arith.cmpi ne, %20, %c0_i32_18 : i32
    scf.if %21 {
      %c0_19 = arith.constant 0 : index
      %c0_20 = arith.constant 0 : index
      %22 = vector.load %arg8[%c0_19, %c0_20] : memref<8x32xf32, #tpu.memory_space<vmem>>, vector<8x32xf32>
      %c0_21 = arith.constant 0 : index
      %c0_22 = arith.constant 0 : index
      %c0_23 = arith.constant 0 : index
      %23 = vector.load %arg6[%c0_21, %c0_22, %c0_23] : memref<8x8x32xf32, #tpu.memory_space<vmem>>, vector<8x8x32xf32>
      %cst = arith.constant dense<0.000000e+00> : vector<8x32xf32>
      %24 = vector.multi_reduction <add>, %23, %cst [1] : vector<8x8x32xf32> to vector<8x32xf32>
      %c0_24 = arith.constant 0 : index
      %c0_25 = arith.constant 0 : index
      %c0_26 = arith.constant 0 : index
      %25 = vector.load %arg7[%c0_24, %c0_25, %c0_26] : memref<8x8x32xf32, #tpu.memory_space<vmem>>, vector<8x8x32xf32>
      %cst_27 = arith.constant dense<0.000000e+00> : vector<8x32xf32>
      %26 = vector.multi_reduction <add>, %25, %cst_27 [1] : vector<8x8x32xf32> to vector<8x32xf32>
      %cst_28 = arith.constant 0.000000e+00 : f32
      %27 = vector.broadcast %cst_28 : f32 to vector<8x32xf32>
      %28 = arith.mulf %27, %22 : vector<8x32xf32>
      %29 = arith.addf %24, %28 : vector<8x32xf32>
      %30 = arith.mulf %22, %22 : vector<8x32xf32>
      %cst_29 = arith.constant 0.000000e+00 : f32
      %31 = vector.broadcast %cst_29 : f32 to vector<8x32xf32>
      %32 = arith.mulf %31, %30 : vector<8x32xf32>
      %33 = arith.subf %26, %32 : vector<8x32xf32>
      %cst_30 = arith.constant 1.250000e-01 : f32
      %34 = vector.broadcast %cst_30 : f32 to vector<8x32xf32>
      %35 = arith.mulf %29, %34 : vector<8x32xf32>
      %36 = arith.addf %35, %22 : vector<8x32xf32>
      %37 = arith.mulf %35, %35 : vector<8x32xf32>
      %cst_31 = arith.constant 8.000000e+00 : f32
      %38 = vector.broadcast %cst_31 : f32 to vector<8x32xf32>
      %39 = arith.mulf %38, %37 : vector<8x32xf32>
      %40 = arith.subf %33, %39 : vector<8x32xf32>
      %cst_32 = arith.constant 0.142857149 : f32
      %41 = vector.broadcast %cst_32 : f32 to vector<8x32xf32>
      %42 = arith.mulf %40, %41 : vector<8x32xf32>
      %cst_33 = arith.constant 0.000000e+00 : f32
      %43 = vector.broadcast %cst_33 : f32 to vector<8x32xf32>
      %44 = arith.maximumf %42, %43 : vector<8x32xf32>
      %45 = math.sqrt %44 : vector<8x32xf32>
      %c0_34 = arith.constant 0 : index
      %c0_35 = arith.constant 0 : index
      %46 = vector.load %arg3[%c0_34, %c0_35] : memref<64x128xf32, #tpu.memory_space<vmem>>, vector<32x128xf32>
      %c32 = arith.constant 32 : index
      %c0_36 = arith.constant 0 : index
      %47 = vector.load %arg3[%c32, %c0_36] : memref<64x128xf32, #tpu.memory_space<vmem>>, vector<32x128xf32>
      %cst_37 = arith.constant dense<0.000000e+00> : vector<8x128xf32>
      %48 = tpu.matmul %36, %46, %cst_37 {dimension_numbers = #tpu.dot_dimension_numbers<[1], [0], [0], [1], [0, 0, 1, 1], [], []>} : vector<8x32xf32>, vector<32x128xf32>, vector<8x128xf32> -> vector<8x128xf32>
      %cst_38 = arith.constant dense<0.000000e+00> : vector<8x128xf32>
      %49 = tpu.matmul %45, %47, %cst_38 {dimension_numbers = #tpu.dot_dimension_numbers<[1], [0], [0], [1], [0, 0, 1, 1], [], []>} : vector<8x32xf32>, vector<32x128xf32>, vector<8x128xf32> -> vector<8x128xf32>
      %50 = arith.addf %48, %49 : vector<8x128xf32>
      %c0_39 = arith.constant 0 : index
      %c0_40 = arith.constant 0 : index
      %51 = vector.load %arg4[%c0_39, %c0_40] : memref<1x128xf32, #tpu.memory_space<vmem>>, vector<1x128xf32>
      %52 = vector.broadcast %51 : vector<1x128xf32> to vector<8x128xf32>
      %53 = arith.addf %50, %52 : vector<8x128xf32>
      %c0_41 = arith.constant 0 : index
      %c0_42 = arith.constant 0 : index
      %54 = vector.load %arg5[%c0_41, %c0_42] : memref<8x128xf32, #tpu.memory_space<vmem>>, vector<8x128xf32>
      tpu.vector_store %arg5[%c0_41, %c0_42], %53 {strides = array<i32>} : memref<8x128xf32, #tpu.memory_space<vmem>>, vector<8x128xf32>,
    } else {
    }
    return
  }
  func.func @transform_0(%arg0: i32, %arg1: i32) -> (i32, i32, i32) {
    %c0_i32 = arith.constant 0 : i32
    %c0_i32_0 = arith.constant 0 : i32
    return %arg0, %arg1, %c0_i32 : i32, i32, i32
  }
  func.func @transform_1(%arg0: i32, %arg1: i32) -> (i32, i32) {
    %c0_i32 = arith.constant 0 : i32
    %c0_i32_0 = arith.constant 0 : i32
    %c0_i32_1 = arith.constant 0 : i32
    return %c0_i32, %c0_i32_0 : i32, i32
  }
  func.func @transform_2(%arg0: i32, %arg1: i32) -> (i32, i32) {
    %c0_i32 = arith.constant 0 : i32
    %c0_i32_0 = arith.constant 0 : i32
    %c0_i32_1 = arith.constant 0 : i32
    return %c0_i32, %c0_i32_0 : i32, i32
  }
  func.func @transform_3(%arg0: i32, %arg1: i32) -> (i32, i32) {
    %c0_i32 = arith.constant 0 : i32
    %c0_i32_0 = arith.constant 0 : i32
    return %arg0, %c0_i32 : i32, i32
  }
}

module attributes {stable_mosaic.version = 11 : i64} {
  func.func @_la_head_kernel(%arg0: i32, %arg1: i32, %arg2: memref<8x8x32xf32, #tpu.memory_space<vmem>>, %arg3: memref<64x128xf32, #tpu.memory_space<vmem>>, %arg4: memref<1x128xf32, #tpu.memory_space<vmem>>, %arg5: memref<8x128xf32, #tpu.memory_space<vmem>>, %arg6: memref<8x8x32xf32, #tpu.memory_space<vmem>>, %arg7: memref<8x8x32xf32, #tpu.memory_space<vmem>>, %arg8: memref<8x32xf32, #tpu.memory_space<vmem>>) attributes {dimension_semantics = [#tpu.dimension_semantics<parallel>, #tpu.dimension_semantics<arbitrary>], iteration_bounds = array<i64: 1, 1>, scalar_prefetch = 0 : i64, scratch_operands = 3 : i64, tpu.core_type = #tpu.core_type<tc>, window_params = [{transform_indices = @transform_0, window_bounds = array<i64: 8, 8, 32>}, {pipeline_mode = #tpu.pipeline_mode<synchronous>, transform_indices = @transform_1, window_bounds = array<i64: 64, 128>}, {pipeline_mode = #tpu.pipeline_mode<synchronous>, transform_indices = @transform_2, window_bounds = array<i64: 1, 128>}, {transform_indices = @transform_3, window_bounds = array<i64: 8, 128>}]} {
    %c0_i32 = arith.constant 0 : i32
    %0 = arith.cmpi eq, %arg1, %c0_i32 : i32
    %1 = arith.extui %0 : i1 to i32
    %c0_i32_0 = arith.constant 0 : i32
    %2 = arith.cmpi ne, %1, %c0_i32_0 : i32
    scf.if %2 {
      %c0_19 = arith.constant 0 : index
      %c0_20 = arith.constant 0 : index
      %c0_21 = arith.constant 0 : index
      %22 = vector.load %arg2[%c0_19, %c0_20, %c0_21] : memref<8x8x32xf32, #tpu.memory_space<vmem>>, vector<8x1x32xf32>
      %23 = vector.shape_cast %22 : vector<8x1x32xf32> to vector<8x32xf32>
      %c0_22 = arith.constant 0 : index
      %c0_23 = arith.constant 0 : index
      %24 = vector.load %arg8[%c0_22, %c0_23] : memref<8x32xf32, #tpu.memory_space<vmem>>, vector<8x32xf32>
      tpu.vector_store %arg8[%c0_22, %c0_23], %23 {strides = array<i32>} : memref<8x32xf32, #tpu.memory_space<vmem>>, vector<8x32xf32>,
      %cst = arith.constant 0.000000e+00 : f32
      %25 = vector.broadcast %cst : f32 to vector<8x8x32xf32>
      %c0_24 = arith.constant 0 : index
      %c0_25 = arith.constant 0 : index
      %c0_26 = arith.constant 0 : index
      %26 = vector.load %arg6[%c0_24, %c0_25, %c0_26] : memref<8x8x32xf32, #tpu.memory_space<vmem>>, vector<8x8x32xf32>
      tpu.vector_store %arg6[%c0_24, %c0_25, %c0_26], %25 {strides = array<i32>} : memref<8x8x32xf32, #tpu.memory_space<vmem>>, vector<8x8x32xf32>,
      %cst_27 = arith.constant 0.000000e+00 : f32
      %27 = vector.broadcast %cst_27 : f32 to vector<8x8x32xf32>
      %c0_28 = arith.constant 0 : index
      %c0_29 = arith.constant 0 : index
      %c0_30 = arith.constant 0 : index
      %28 = vector.load %arg7[%c0_28, %c0_29, %c0_30] : memref<8x8x32xf32, #tpu.memory_space<vmem>>, vector<8x8x32xf32>
      tpu.vector_store %arg7[%c0_28, %c0_29, %c0_30], %27 {strides = array<i32>} : memref<8x8x32xf32, #tpu.memory_space<vmem>>, vector<8x8x32xf32>,
    } else {
    }
    %c0 = arith.constant 0 : index
    %c0_1 = arith.constant 0 : index
    %3 = vector.load %arg8[%c0, %c0_1] : memref<8x32xf32, #tpu.memory_space<vmem>>, vector<8x32xf32>
    %4 = vector.shape_cast %3 : vector<8x32xf32> to vector<8x1x32xf32>
    %5 = vector.shape_cast %4 : vector<8x1x32xf32> to vector<8x1x32xf32>
    %6 = vector.broadcast %5 : vector<8x1x32xf32> to vector<8x8x32xf32>
    %c0_i32_2 = arith.constant 0 : i32
    %c8_i32 = arith.constant 8 : i32
    %7 = arith.muli %c0_i32_2, %c8_i32 : i32
    %8 = tpu.assume_multiple %7, 8 : i32
    %c0_3 = arith.constant 0 : index
    %9 = arith.index_cast %8 : i32 to index
    %c0_4 = arith.constant 0 : index
    %10 = vector.load %arg2[%c0_3, %9, %c0_4] : memref<8x8x32xf32, #tpu.memory_space<vmem>>, vector<8x8x32xf32>
    %11 = arith.subf %10, %6 : vector<8x8x32xf32>
    %c0_5 = arith.constant 0 : index
    %c0_6 = arith.constant 0 : index
    %c0_7 = arith.constant 0 : index
    %12 = vector.load %arg6[%c0_5, %c0_6, %c0_7] : memref<8x8x32xf32, #tpu.memory_space<vmem>>, vector<8x8x32xf32>
    %13 = arith.addf %12, %11 : vector<8x8x32xf32>
    %c0_8 = arith.constant 0 : index
    %c0_9 = arith.constant 0 : index
    %c0_10 = arith.constant 0 : index
    %14 = vector.load %arg6[%c0_8, %c0_9, %c0_10] : memref<8x8x32xf32, #tpu.memory_space<vmem>>, vector<8x8x32xf32>
    tpu.vector_store %arg6[%c0_8, %c0_9, %c0_10], %13 {strides = array<i32>} : memref<8x8x32xf32, #tpu.memory_space<vmem>>, vector<8x8x32xf32>,
    %c0_11 = arith.constant 0 : index
    %c0_12 = arith.constant 0 : index
    %c0_13 = arith.constant 0 : index
    %15 = vector.load %arg7[%c0_11, %c0_12, %c0_13] : memref<8x8x32xf32, #tpu.memory_space<vmem>>, vector<8x8x32xf32>
    %16 = arith.mulf %11, %11 : vector<8x8x32xf32>
    %17 = arith.addf %15, %16 : vector<8x8x32xf32>
    %c0_14 = arith.constant 0 : index
    %c0_15 = arith.constant 0 : index
    %c0_16 = arith.constant 0 : index
    %18 = vector.load %arg7[%c0_14, %c0_15, %c0_16] : memref<8x8x32xf32, #tpu.memory_space<vmem>>, vector<8x8x32xf32>
    tpu.vector_store %arg7[%c0_14, %c0_15, %c0_16], %17 {strides = array<i32>} : memref<8x8x32xf32, #tpu.memory_space<vmem>>, vector<8x8x32xf32>,
    %c1_i32 = arith.constant 1 : i32
    %c0_i32_17 = arith.constant 0 : i32
    %19 = arith.cmpi eq, %arg1, %c0_i32_17 : i32
    %20 = arith.extui %19 : i1 to i32
    %c0_i32_18 = arith.constant 0 : i32
    %21 = arith.cmpi ne, %20, %c0_i32_18 : i32
    scf.if %21 {
      %c0_19 = arith.constant 0 : index
      %c0_20 = arith.constant 0 : index
      %22 = vector.load %arg8[%c0_19, %c0_20] : memref<8x32xf32, #tpu.memory_space<vmem>>, vector<8x32xf32>
      %c0_21 = arith.constant 0 : index
      %c0_22 = arith.constant 0 : index
      %c0_23 = arith.constant 0 : index
      %23 = vector.load %arg6[%c0_21, %c0_22, %c0_23] : memref<8x8x32xf32, #tpu.memory_space<vmem>>, vector<8x8x32xf32>
      %cst = arith.constant dense<0.000000e+00> : vector<8x32xf32>
      %24 = vector.multi_reduction <add>, %23, %cst [1] : vector<8x8x32xf32> to vector<8x32xf32>
      %c0_24 = arith.constant 0 : index
      %c0_25 = arith.constant 0 : index
      %c0_26 = arith.constant 0 : index
      %25 = vector.load %arg7[%c0_24, %c0_25, %c0_26] : memref<8x8x32xf32, #tpu.memory_space<vmem>>, vector<8x8x32xf32>
      %cst_27 = arith.constant dense<0.000000e+00> : vector<8x32xf32>
      %26 = vector.multi_reduction <add>, %25, %cst_27 [1] : vector<8x8x32xf32> to vector<8x32xf32>
      %cst_28 = arith.constant 0.000000e+00 : f32
      %27 = vector.broadcast %cst_28 : f32 to vector<8x32xf32>
      %28 = arith.mulf %27, %22 : vector<8x32xf32>
      %29 = arith.addf %24, %28 : vector<8x32xf32>
      %30 = arith.mulf %22, %22 : vector<8x32xf32>
      %cst_29 = arith.constant 0.000000e+00 : f32
      %31 = vector.broadcast %cst_29 : f32 to vector<8x32xf32>
      %32 = arith.mulf %31, %30 : vector<8x32xf32>
      %33 = arith.subf %26, %32 : vector<8x32xf32>
      %cst_30 = arith.constant 1.250000e-01 : f32
      %34 = vector.broadcast %cst_30 : f32 to vector<8x32xf32>
      %35 = arith.mulf %29, %34 : vector<8x32xf32>
      %36 = arith.addf %35, %22 : vector<8x32xf32>
      %37 = arith.mulf %35, %35 : vector<8x32xf32>
      %cst_31 = arith.constant 8.000000e+00 : f32
      %38 = vector.broadcast %cst_31 : f32 to vector<8x32xf32>
      %39 = arith.mulf %38, %37 : vector<8x32xf32>
      %40 = arith.subf %33, %39 : vector<8x32xf32>
      %cst_32 = arith.constant 0.142857149 : f32
      %41 = vector.broadcast %cst_32 : f32 to vector<8x32xf32>
      %42 = arith.mulf %40, %41 : vector<8x32xf32>
      %cst_33 = arith.constant 0.000000e+00 : f32
      %43 = vector.broadcast %cst_33 : f32 to vector<8x32xf32>
      %44 = arith.maximumf %42, %43 : vector<8x32xf32>
      %45 = math.sqrt %44 : vector<8x32xf32>
      %c0_34 = arith.constant 0 : index
      %c0_35 = arith.constant 0 : index
      %46 = vector.load %arg3[%c0_34, %c0_35] : memref<64x128xf32, #tpu.memory_space<vmem>>, vector<32x128xf32>
      %c32 = arith.constant 32 : index
      %c0_36 = arith.constant 0 : index
      %47 = vector.load %arg3[%c32, %c0_36] : memref<64x128xf32, #tpu.memory_space<vmem>>, vector<32x128xf32>
      %cst_37 = arith.constant dense<0.000000e+00> : vector<8x128xf32>
      %48 = tpu.matmul %36, %46, %cst_37 {dimension_numbers = #tpu.dot_dimension_numbers<[1], [0], [0], [1], [0, 0, 1, 1], [], []>} : vector<8x32xf32>, vector<32x128xf32>, vector<8x128xf32> -> vector<8x128xf32>
      %cst_38 = arith.constant dense<0.000000e+00> : vector<8x128xf32>
      %49 = tpu.matmul %45, %47, %cst_38 {dimension_numbers = #tpu.dot_dimension_numbers<[1], [0], [0], [1], [0, 0, 1, 1], [], []>} : vector<8x32xf32>, vector<32x128xf32>, vector<8x128xf32> -> vector<8x128xf32>
      %50 = arith.addf %48, %49 : vector<8x128xf32>
      %c0_39 = arith.constant 0 : index
      %c0_40 = arith.constant 0 : index
      %51 = vector.load %arg4[%c0_39, %c0_40] : memref<1x128xf32, #tpu.memory_space<vmem>>, vector<1x128xf32>
      %52 = vector.broadcast %51 : vector<1x128xf32> to vector<8x128xf32>
      %53 = arith.addf %50, %52 : vector<8x128xf32>
      %c0_41 = arith.constant 0 : index
      %c0_42 = arith.constant 0 : index
      %54 = vector.load %arg5[%c0_41, %c0_42] : memref<8x128xf32, #tpu.memory_space<vmem>>, vector<8x128xf32>
      tpu.vector_store %arg5[%c0_41, %c0_42], %53 {strides = array<i32>} : memref<8x128xf32, #tpu.memory_space<vmem>>, vector<8x128xf32>,
    } else {
    }
    return
  }
  func.func @transform_0(%arg0: i32, %arg1: i32) -> (i32, i32, i32) {
    %c0_i32 = arith.constant 0 : i32
    %c0_i32_0 = arith.constant 0 : i32
    return %arg0, %arg1, %c0_i32 : i32, i32, i32
  }
  func.func @transform_1(%arg0: i32, %arg1: i32) -> (i32, i32) {
    %c0_i32 = arith.constant 0 : i32
    %c0_i32_0 = arith.constant 0 : i32
    %c0_i32_1 = arith.constant 0 : i32
    return %c0_i32, %c0_i32_0 : i32, i32
  }
  func.func @transform_2(%arg0: i32, %arg1: i32) -> (i32, i32) {
    %c0_i32 = arith.constant 0 : i32
    %c0_i32_0 = arith.constant 0 : i32
    %c0_i32_1 = arith.constant 0 : i32
    return %c0_i32, %c0_i32_0 : i32, i32
  }
  func.func @transform_3(%arg0: i32, %arg1: i32) -> (i32, i32) {
    %c0_i32 = arith.constant 0 : i32
    %c0_i32_0 = arith.constant 0 : i32
    return %arg0, %c0_i32 : i32, i32
  }
}

</mosaic_0001>

<bundles_post_ra>
// kernel: tpu_custom_call.1
= control target key start
LH: loop header
LB: loop body
LE: loop exit
PB: predicated region body
PF: predicated region fallthrough
CT: control target
= control target key end

     0   :  { %8 = vsyncpa [#allocation6], 0  ;;  %s1282_s0 = inlined_call_operand.hbm [shape: f32[8,8,32], index: 0, kind: input, shape index: {}]   ;;  %s1283_s1 = inlined_call_operand.hbm [shape: f32[64,128], index: 1, kind: input, shape index: {}]   ;;  %s1284_s2 = inlined_call_operand.vmem [shape: f32[1,128], index: 2, kind: input, shape index: {}]   ;;  %s1285_s3 = inlined_call_operand.hbm [shape: f32[8,128], index: 3, kind: output, shape index: {}]  }
   0x1   :  { %9 = vsyncpa [#allocation9], 0 }
   0x2   :  { %10 = vsyncpa [#allocation7], 0  ;;  %s951_s12 = smov [#allocation5]   ;;  %s879_s16 = scalar_lea.hbm %s1282_s0, 1024 }
   0x3   :  { %s16_s13 = sshll.u32 %s951_s12, 4  ;;  %p880_p0 = scmp.ne.s32.totalorder %s1282_s0, %s879_s16  ;;  %s17_s13 = int_to_ptr.vmem [resolvable:$true] %s16_s13 }
   0x4   :  { %p883_p1 = scmp.lt.u32.totalorder %s879_s16, %s1282_s0 }
   0x6   :  { %p885_p2 = pnand %p883_p1, %p880_p0 }
   0x8   :  { %888 = shalt.err (!%p885_p2)
}
   0x9   :  { %s889_s21 = scalar_lea.vmem %s17_s13, 1024  ;;  %p894_p4 = scmp.lt.s32.totalorder %s17_s13, %s17_s13 }
   0xa   :  { %p890_p3 = scmp.ne.s32.totalorder %s17_s13, %s889_s21  ;;  %p895_p5 = scmp.lt.s32.totalorder %s889_s21, %s889_s21 }
   0xc   :  { %p896_p6 = por %p895_p5, %p894_p4 }
   0xe   :  { %p897_p7 = pnand %p896_p6, %p890_p3 }
  0x10   :  { %900 = shalt.err (!%p897_p7)
}
  0x11   :  { %s952_s22 = smov 128   ;;  %s953_s23 = smov 8  }
  0x12   :  { %22 = dma.hbm_to_vmem [thread:$0]  %s1282_s0, 1024, %s17_s13, [#allocation6], %s952_s22, %s952_s22, %s953_s23  }
  0x13   :  { %s954_s26 = smov [#allocation8]   ;;  %s901_s30 = scalar_lea.hbm %s1283_s1, 1024 }
  0x14   :  { %s28_s27 = sshll.u32 %s954_s26, 4  ;;  %p902_p8 = scmp.ne.s32.totalorder %s1283_s1, %s901_s30  ;;  %s29_s27 = int_to_ptr.vmem [resolvable:$true] %s28_s27 }
  0x15   :  { %p905_p9 = scmp.lt.u32.totalorder %s901_s30, %s1283_s1 }
  0x17   :  { %p907_p10 = pnand %p905_p9, %p902_p8 }
  0x19   :  { %910 = shalt.err (!%p907_p10)
}
  0x1a   :  { %s911_s8 = scalar_lea.vmem %s29_s27, 1024  ;;  %p916_p12 = scmp.lt.s32.totalorder %s29_s27, %s29_s27 }
  0x1b   :  { %p912_p11 = scmp.ne.s32.totalorder %s29_s27, %s911_s8  ;;  %p917_p13 = scmp.lt.s32.totalorder %s911_s8, %s911_s8 }
  0x1d   :  { %p918_p0 = por %p917_p13, %p916_p12 }
  0x1f   :  { %p919_p1 = pnand %p918_p0, %p912_p11 }
  0x21   :  { %922 = shalt.err (!%p919_p1)
}
  0x22   :  { %34 = dma.hbm_to_vmem [thread:$0]  %s1283_s1, 1024, %s29_s27, [#allocation9], %s952_s22, %s952_s22, %s953_s23  }
  0x23   :  { %945 = dma.done.wait [#allocation6], 1024  }
  0x24   :  { %946 = vsyncadd [#allocation6], 4294966272 }
  0x25   :  { %947 = dma.done.wait [#allocation9], 1024  }
  0x26   :  { %948 = vsyncadd [#allocation9], 4294966272  ;;  %v955_v0 = vmov 0.0|0.0   ;;  %vm956_vm0 = vmmov 0   ;;  %v957_v1 = vmov 0.0   ;;  %vm1286_vm1 = vcmask 261120  }
  0x27   :  { %847 = vmatprep.subr.bf16.mxu1 %v955_v0  ;;  %841 = vmatprep.subr.bf16.mxu0 %v955_v0  ;;  %87 = vst.msk [vmem:[#allocation2] sm:$0xff] %vm1286_vm1, %v957_v1  ;;  %88 = vst.msk [vmem:[#allocation2 + $0x8] sm:$0xff] %vm1286_vm1, %v957_v1  ;;  %v578_v2 = vld [vmem:[#allocation8] sm:$0xff]  ;;  %v579_v3 = vld [vmem:[#allocation8 + $0x8] sm:$0xff]  ;;  %vm64_vm2 = vcmask 1041409   ;;  %vm67_vm3 = vcmask 1042434   ;;  %v109_v35 = vlaneseq }
  0x28   :  { %838 = vmatprep.mubr.msk.f32.mxu1 %vm956_vm0, %v957_v1  ;;  %827 = vmatprep.mubr.msk.f32.mxu0 %vm956_vm0, %v957_v1  ;;  %89 = vst.msk [vmem:[#allocation2 + $0x10] sm:$0xff] %vm1286_vm1, %v957_v1  ;;  %90 = vst.msk [vmem:[#allocation2 + $0x18] sm:$0xff] %vm1286_vm1, %v957_v1  ;;  %v582_v4 = vld [vmem:[#allocation8 + $0x20] sm:$0xff]  ;;  %v848_v5 = vpack.c.bf16 %v579_v3, %v578_v2  ;;  %v583_v6 = vld [vmem:[#allocation8 + $0x28] sm:$0xff]  ;;  %vm1291_vm4 = vcmask 1043459   ;;  %vm1290_vm5 = vcmask 1044484  }
  0x29   :  { %91 = vst.msk [vmem:[#allocation2 + $0x20] sm:$0xff] %vm1286_vm1, %v957_v1  ;;  %92 = vst.msk [vmem:[#allocation2 + $0x28] sm:$0xff] %vm1286_vm1, %v957_v1  ;;  %v580_v7 = vld [vmem:[#allocation8 + $0x10] sm:$0xff]  ;;  %v581_v8 = vld [vmem:[#allocation8 + $0x18] sm:$0xff]  ;;  %v842_v9 = vpack.c.bf16 %v583_v6, %v582_v4  ;;  %vm1289_vm6 = vcmask 1045509   ;;  %vm1288_vm7 = vcmask 1046534  }
  0x2a   :  { %93 = vst.msk [vmem:[#allocation2 + $0x30] sm:$0xff] %vm1286_vm1, %v957_v1  ;;  %94 = vst.msk [vmem:[#allocation2 + $0x38] sm:$0xff] %vm1286_vm1, %v957_v1  ;;  %v584_v10 = vld [vmem:[#allocation8 + $0x30] sm:$0xff]  ;;  %v585_v11 = vld [vmem:[#allocation8 + $0x38] sm:$0xff]  ;;  %849 = vmatpush3.bf16.msra.mxu1 %v848_v5  ;;  %v851_v12 = vpack.c.bf16 %v581_v8, %v580_v7  ;;  %vm1287_vm8 = vcmask 1047559   ;;  %v110_v40 = vshrl.u32 %v109_v35, 7 }
  0x2b   :  { %95 = vst.msk [vmem:[#allocation3] sm:$0xff] %vm1286_vm1, %v957_v1  ;;  %96 = vst.msk [vmem:[#allocation3 + $0x8] sm:$0xff] %vm1286_vm1, %v957_v1  ;;  %v48_v13 = vld [vmem:[#allocation5 + $0x8] sm:$0x1]  ;;  %v49_v14 = vld [vmem:[#allocation5 + $0x10] sm:$0x1]  ;;  %843 = vmatpush3.bf16.msra.mxu0 %v842_v9  ;;  %850 = vmatprep.subr.bf16.mxu1 %v955_v0  ;;  %v845_v16 = vpack.c.bf16 %v585_v11, %v584_v10 }
  0x2c   :  { %97 = vst.msk [vmem:[#allocation3 + $0x10] sm:$0xff] %vm1286_vm1, %v957_v1  ;;  %98 = vst.msk [vmem:[#allocation3 + $0x18] sm:$0xff] %vm1286_vm1, %v957_v1  ;;  %v50_v15 = vld [vmem:[#allocation5 + $0x18] sm:$0x1]  ;;  %v47_v17 = vld [vmem:[#allocation5] sm:$0x1]  ;;  %844 = vmatprep.subr.bf16.mxu0 %v955_v0 }
  0x2d   :  { %99 = vst.msk [vmem:[#allocation3 + $0x20] sm:$0xff] %vm1286_vm1, %v957_v1  ;;  %100 = vst.msk [vmem:[#allocation3 + $0x28] sm:$0xff] %vm1286_vm1, %v957_v1  ;;  %v51_v18 = vld [vmem:[#allocation5 + $0x20] sm:$0x1]  ;;  %v52_v19 = vld [vmem:[#allocation5 + $0x28] sm:$0x1] }
  0x2e   :  { %101 = vst.msk [vmem:[#allocation3 + $0x30] sm:$0xff] %vm1286_vm1, %v957_v1  ;;  %102 = vst.msk [vmem:[#allocation3 + $0x38] sm:$0xff] %vm1286_vm1, %v957_v1  ;;  %v53_v20 = vld [vmem:[#allocation5 + $0x30] sm:$0x1]  ;;  %v63_v21 = vrot.slane %v48_v13, 7  ;;  %v66_v22 = vrot.slane %v49_v14, 6  ;;  %852 = vmatpush3.bf16.msra.mxu1 %v851_v12 }
  0x2f   :  { %v69_v23 = vrot.slane %v50_v15, 5  ;;  %v54_v24 = vld [vmem:[#allocation5 + $0x38] sm:$0x1]  ;;  %v72_v25 = vrot.slane %v51_v18, 4  ;;  %v75_v27 = vrot.slane %v52_v19, 3  ;;  %846 = vmatpush3.bf16.msra.mxu0 %v845_v16  ;;  %v78_v29 = vrot.slane %v53_v20, 2 }
  0x30   :  { %v65_v26 = vsel %vm64_vm2, %v63_v21, %v47_v17  ;;  %v81_v31 = vrot.slane %v54_v24, 1  ;;  %v958_v33 = vmov 1966171168   ;;  %v156_v48 = vsub.s32 0, %v110_v40  ;;  %v194_v54 = vld [vmem:[#allocation5] sm:$0xff]  ;;  %v195_v56 = vld [vmem:[#allocation5 + $0x8] sm:$0xff] }
  0x31   :  { %v68_v28 = vsel %vm67_vm3, %v66_v22, %v65_v26  ;;  %v107_v34 = vunpack.c.l.s4 %v958_v33  ;;  %v196_v57 = vld [vmem:[#allocation5 + $0x10] sm:$0xff]  ;;  %v197_v63 = vld [vmem:[#allocation5 + $0x18] sm:$0xff]  ;;  %v198_v0 = vld [vmem:[#allocation5 + $0x20] sm:$0xff]  ;;  %s959_s11 = smov [#allocation10]  }
  0x32   :  { %v71_v30 = vsel %vm1291_vm4, %v69_v23, %v68_v28  ;;  %v210_v1 = vld [vmem:[#allocation2] sm:$0xff]  ;;  %v199_v4 = vld [vmem:[#allocation5 + $0x28] sm:$0xff]  ;;  %v200_v5 = vld [vmem:[#allocation5 + $0x30] sm:$0xff]  ;;  %s796_s12 = sshll.u32 %s959_s11, 4  ;;  %s797_s12 = int_to_ptr.vmem [resolvable:$true] %s796_s12 }
  0x33   :  { %v74_v32 = vsel %vm1290_vm5, %v72_v25, %v71_v30  ;;  %v108_v39 = vunpack.c.0.s8 %v107_v34  ;;  %v201_v6 = vld [vmem:[#allocation5 + $0x38] sm:$0xff]  ;;  %v211_v13 = vld [vmem:[#allocation2 + $0x8] sm:$0xff]  ;;  %v212_v14 = vld [vmem:[#allocation2 + $0x10] sm:$0xff]  ;;  %s923_s13 = scalar_lea.vmem %s797_s12, 128  ;;  %p928_p3 = scmp.lt.s32.totalorder %s797_s12, %s797_s12 }
  0x34   :  { %v77_v36 = vsel %vm1289_vm6, %v75_v27, %v74_v32  ;;  %v214_v15 = vld [vmem:[#allocation2 + $0x20] sm:$0xff]  ;;  %v213_v19 = vld [vmem:[#allocation2 + $0x18] sm:$0xff]  ;;  %v215_v20 = vld [vmem:[#allocation2 + $0x28] sm:$0xff]  ;;  %p924_p2 = scmp.ne.s32.totalorder %s797_s12, %s923_s13  ;;  %p929_p4 = scmp.lt.s32.totalorder %s923_s13, %s923_s13 }
  0x35   :  { %v80_v37 = vsel %vm1288_vm7, %v78_v29, %v77_v36  ;;  %v111_v41 = vsub.s32 %v108_v39, %v110_v40  ;;  %v216_v21 = vld [vmem:[#allocation2 + $0x30] sm:$0xff]  ;;  %v217_v27 = vld [vmem:[#allocation2 + $0x38] sm:$0xff]  ;;  %v236_v32 = vld [vmem:[#allocation3 + $0x8] sm:$0xff] }
  0x36   :  { %v83_v38 = vsel %vm1287_vm8, %v81_v31, %v80_v37  ;;  %v235_v31 = vld [vmem:[#allocation3] sm:$0xff]  ;;  %v238_v39 = vld [vmem:[#allocation3 + $0x18] sm:$0xff]  ;;  %p930_p5 = por %p929_p4, %p928_p3 }
  0x37   :  { %86 = vst.msk [vmem:[#allocation4] sm:$0xff] %vm1286_vm1, %v83_v38  ;;  %v237_v38 = vld [vmem:[#allocation3 + $0x10] sm:$0xff]  ;;  %v239_v40 = vld [vmem:[#allocation3 + $0x20] sm:$0xff] }
  0x38   :  { %p931_p6 = pnand %p930_p5, %p924_p2 }
  0x3e   :  { %v1028_v42 = vld [vmem:[#allocation4] sm:$0xff] }
  0x3f   :  { %v105_v43 = vcombine.high %v1028_v42, %v1028_v42  ;;  %v112_v44 = vrot.slane %v1028_v42, %v111_v41  ;;  %v424_v49 = vmul.f32 %v1028_v42, %v1028_v42  ;;  %v1036_v58 = vmul.f32 0.0, %v1028_v42 }
  0x41   :  { %v119_v45 = vrot.slane %v105_v43, %v111_v41  ;;  %v120_v46 = vcombine.high %v112_v44, %v112_v44  ;;  %v128_v47 = vrot.slane %v112_v44, %v111_v41  ;;  %v1038_v8 = vmul.f32 0.0, %v424_v49  ;;  %v241_v43 = vld [vmem:[#allocation3 + $0x30] sm:$0xff]  ;;  %v242_v44 = vld [vmem:[#allocation3 + $0x38] sm:$0xff] }
  0x43   :  { %v121_v50 = vcombine.high %v119_v45, %v119_v45  ;;  %v135_v51 = vrot.slane %v119_v45, %v111_v41  ;;  %v142_v52 = vrot.slane %v120_v46, %v111_v41  ;;  %v150_v53 = vcombine.high %v128_v47, %v128_v47 }
  0x44   :  { %v157_v55 = vrot.slane %v128_v47, %v156_v48 }
  0x45   :  { %v149_v59 = vrot.slane %v121_v50, %v111_v41  ;;  %v151_v60 = vcombine.high %v135_v51, %v135_v51  ;;  %v152_v61 = vcombine.high %v142_v52, %v142_v52  ;;  %v161_v62 = vrot.slane %v142_v52, %v156_v48  ;;  %v240_v41 = vld [vmem:[#allocation3 + $0x28] sm:$0xff] }
  0x46   :  { %v165_v2 = vrot.slane %v150_v53, %v156_v48  ;;  %v173_v3 = vrot.slane %v135_v51, %v156_v48  ;;  %v202_v7 = vsub.f32 %v194_v54, %v157_v55 }
  0x47   :  { %v153_v9 = vcombine.high %v149_v59, %v149_v59  ;;  %v169_v10 = vrot.slane %v152_v61, %v156_v48  ;;  %v177_v11 = vrot.slane %v149_v59, %v156_v48  ;;  %v181_v12 = vrot.slane %v151_v60, %v156_v48 }
  0x48   :  { %v203_v16 = vsub.f32 %v195_v56, %v161_v62  ;;  %v204_v17 = vsub.f32 %v196_v57, %v165_v2  ;;  %v206_v18 = vsub.f32 %v198_v0, %v173_v3  ;;  %v218_v22 = vadd.f32 %v210_v1, %v202_v7 }
  0x49   :  { %v185_v23 = vrot.slane %v153_v9, %v156_v48  ;;  %v205_v24 = vsub.f32 %v197_v63, %v169_v10  ;;  %v207_v25 = vsub.f32 %v199_v4, %v177_v11  ;;  %v208_v26 = vsub.f32 %v200_v5, %v181_v12 }
  0x4a   :  { %v219_v28 = vadd.f32 %v211_v13, %v203_v16  ;;  %v220_v29 = vadd.f32 %v212_v14, %v204_v17  ;;  %v222_v30 = vadd.f32 %v214_v15, %v206_v18  ;;  %227 = vst.msk [vmem:[#allocation2] sm:$0xff] %vm1286_vm1, %v218_v22  ;;  %v243_v33 = vmul.f32 %v202_v7, %v202_v7 }
  0x4b   :  { %v209_v34 = vsub.f32 %v201_v6, %v185_v23  ;;  %v221_v35 = vadd.f32 %v213_v19, %v205_v24  ;;  %v223_v36 = vadd.f32 %v215_v20, %v207_v25  ;;  %v224_v37 = vadd.f32 %v216_v21, %v208_v26 }
  0x4c   :  { %228 = vst.msk [vmem:[#allocation2 + $0x8] sm:$0xff] %vm1286_vm1, %v219_v28  ;;  %229 = vst.msk [vmem:[#allocation2 + $0x10] sm:$0xff] %vm1286_vm1, %v220_v29  ;;  %v244_v45 = vmul.f32 %v203_v16, %v203_v16  ;;  %v245_v46 = vmul.f32 %v204_v17, %v204_v17  ;;  %v246_v47 = vmul.f32 %v205_v24, %v205_v24  ;;  %v459_v62 = vrot.slane %v1028_v42, 1 }
  0x4d   :  { %231 = vst.msk [vmem:[#allocation2 + $0x20] sm:$0xff] %vm1286_vm1, %v222_v30  ;;  %v247_v48 = vmul.f32 %v206_v18, %v206_v18  ;;  %v225_v49 = vadd.f32 %v217_v27, %v209_v34  ;;  %230 = vst.msk [vmem:[#allocation2 + $0x18] sm:$0xff] %vm1286_vm1, %v221_v35  ;;  %v248_v50 = vmul.f32 %v207_v25, %v207_v25  ;;  %v460_v63 = vrot.slane %v1028_v42, 2 }
  0x4e   :  { %232 = vst.msk [vmem:[#allocation2 + $0x28] sm:$0xff] %vm1286_vm1, %v223_v36  ;;  %233 = vst.msk [vmem:[#allocation2 + $0x30] sm:$0xff] %vm1286_vm1, %v224_v37  ;;  %v249_v51 = vmul.f32 %v208_v26, %v208_v26  ;;  %v250_v52 = vmul.f32 %v209_v34, %v209_v34  ;;  %v251_v53 = vadd.f32 %v243_v33, %v235_v31  ;;  %v461_v0 = vrot.slane %v1028_v42, 3 }
  0x4f   :  { %v252_v54 = vadd.f32 %v244_v45, %v236_v32  ;;  %v253_v55 = vadd.f32 %v245_v46, %v237_v38  ;;  %v254_v56 = vadd.f32 %v246_v47, %v238_v39  ;;  %234 = vst.msk [vmem:[#allocation2 + $0x38] sm:$0xff] %vm1286_vm1, %v225_v49  ;;  %v255_v57 = vadd.f32 %v247_v48, %v239_v40 }
  0x50   :  { %v256_v59 = vadd.f32 %v248_v50, %v240_v41  ;;  %v257_v60 = vadd.f32 %v249_v51, %v241_v43  ;;  %v258_v61 = vadd.f32 %v250_v52, %v242_v44  ;;  %259 = vst.msk [vmem:[#allocation3] sm:$0xff] %vm1286_vm1, %v251_v53  ;;  %v401_v2 = vrot.slane %v1036_v58, 1 }
  0x51   :  { %260 = vst.msk [vmem:[#allocation3 + $0x8] sm:$0xff] %vm1286_vm1, %v252_v54  ;;  %261 = vst.msk [vmem:[#allocation3 + $0x10] sm:$0xff] %vm1286_vm1, %v253_v55  ;;  %v271_v1 = vld [vmem:[#allocation2] sm:$0xff]  ;;  %v402_v3 = vrot.slane %v1036_v58, 2  ;;  %v403_v4 = vrot.slane %v1036_v58, 3  ;;  %v404_v7 = vrot.slane %v1036_v58, 4 }
  0x52   :  { %262 = vst.msk [vmem:[#allocation3 + $0x18] sm:$0xff] %vm1286_vm1, %v254_v56  ;;  %263 = vst.msk [vmem:[#allocation3 + $0x20] sm:$0xff] %vm1286_vm1, %v255_v57  ;;  %v279_v6 = vsel %vm1286_vm1, %v271_v1, 0.0  ;;  %v405_v9 = vrot.slane %v1036_v58, 5  ;;  %v406_v10 = vrot.slane %v1036_v58, 6  ;;  %v407_v15 = vrot.slane %v1036_v58, 7 }
  0x53   :  { %264 = vst.msk [vmem:[#allocation3 + $0x28] sm:$0xff] %vm1286_vm1, %v256_v59  ;;  %265 = vst.msk [vmem:[#allocation3 + $0x30] sm:$0xff] %vm1286_vm1, %v257_v60  ;;  %v272_v11 = vld [vmem:[#allocation2 + $0x8] sm:$0xff]  ;;  %v273_v12 = vld [vmem:[#allocation2 + $0x10] sm:$0xff]  ;;  %v280_v14 = vrot.slane %v279_v6, 4  ;;  %v427_v16 = vrot.slane %v1038_v8, 1 }
  0x54   :  { %266 = vst.msk [vmem:[#allocation3 + $0x38] sm:$0xff] %vm1286_vm1, %v258_v61  ;;  %v275_v13 = vld [vmem:[#allocation2 + $0x20] sm:$0xff]  ;;  %v274_v17 = vld [vmem:[#allocation2 + $0x18] sm:$0xff]  ;;  %v286_v20 = vsel %vm1286_vm1, %v272_v11, 0.0  ;;  %v293_v21 = vsel %vm1286_vm1, %v273_v12, 0.0  ;;  %v428_v52 = vrot.slane %v1038_v8, 2 }
  0x55   :  { %v276_v18 = vld [vmem:[#allocation2 + $0x28] sm:$0xff]  ;;  %v277_v19 = vld [vmem:[#allocation2 + $0x30] sm:$0xff]  ;;  %v307_v22 = vsel %vm1286_vm1, %v275_v13, 0.0  ;;  %v281_v23 = vadd.f32 %v280_v14, %v279_v6  ;;  %v287_v24 = vrot.slane %v286_v20, 4  ;;  %v294_v25 = vrot.slane %v293_v21, 4 }
  0x56   :  { %v300_v26 = vsel %vm1286_vm1, %v274_v17, 0.0  ;;  %v278_v27 = vld [vmem:[#allocation2 + $0x38] sm:$0xff]  ;;  %v308_v29 = vrot.slane %v307_v22, 4  ;;  %v314_v30 = vsel %vm1286_vm1, %v276_v18, 0.0  ;;  %v321_v31 = vsel %vm1286_vm1, %v277_v19, 0.0 }
  0x57   :  { %v301_v28 = vrot.slane %v300_v26, 4  ;;  %v282_v32 = vrot.slane %v281_v23, 2  ;;  %v288_v33 = vadd.f32 %v287_v24, %v286_v20  ;;  %v295_v34 = vadd.f32 %v294_v25, %v293_v21  ;;  %v335_v57 = vld [vmem:[#allocation3] sm:$0xff] }
  0x58   :  { %v315_v35 = vrot.slane %v314_v30, 4  ;;  %v309_v37 = vadd.f32 %v308_v29, %v307_v22  ;;  %v322_v38 = vrot.slane %v321_v31, 4  ;;  %v328_v39 = vsel %vm1286_vm1, %v278_v27, 0.0  ;;  %v336_v12 = vld [vmem:[#allocation3 + $0x8] sm:$0xff]  ;;  %v337_v13 = vld [vmem:[#allocation3 + $0x10] sm:$0xff] }
  0x59   :  { %v302_v36 = vadd.f32 %v301_v28, %v300_v26  ;;  %v283_v40 = vadd.f32 %v282_v32, %v281_v23  ;;  %v289_v41 = vrot.slane %v288_v33, 2  ;;  %v296_v43 = vrot.slane %v295_v34, 2  ;;  %v338_v19 = vld [vmem:[#allocation3 + $0x18] sm:$0xff]  ;;  %v339_v27 = vld [vmem:[#allocation3 + $0x20] sm:$0xff] }
  0x5a   :  { %v316_v44 = vadd.f32 %v315_v35, %v314_v30  ;;  %v310_v46 = vrot.slane %v309_v37, 2  ;;  %v323_v47 = vadd.f32 %v322_v38, %v321_v31  ;;  %v329_v48 = vrot.slane %v328_v39, 4  ;;  %v340_v28 = vld [vmem:[#allocation3 + $0x28] sm:$0xff]  ;;  %v341_v35 = vld [vmem:[#allocation3 + $0x30] sm:$0xff] }
  0x5b   :  { %v303_v45 = vrot.slane %v302_v36, 2  ;;  %v284_v49 = vrot.slane %v283_v40, 1  ;;  %v290_v50 = vadd.f32 %v289_v41, %v288_v33  ;;  %v1077_v53 = vadd.f32 %v296_v43, %v295_v34 }
  0x5c   :  { %v317_v51 = vrot.slane %v316_v44, 2  ;;  %v1081_v55 = vadd.f32 %v310_v46, %v309_v37  ;;  %v330_v56 = vadd.f32 %v329_v48, %v328_v39  ;;  %v324_v59 = vrot.slane %v323_v47, 2 }
  0x5d   :  { %v1079_v54 = vadd.f32 %v303_v45, %v302_v36  ;;  %v429_v60 = vrot.slane %v1038_v8, 3  ;;  %v430_v61 = vrot.slane %v1038_v8, 4  ;;  %v431_v1 = vrot.slane %v1038_v8, 5 }
  0x5e   :  { %v291_v6 = vrot.slane %v290_v50, 1  ;;  %v1086_v11 = vadd.f32 %v317_v51, %v316_v44  ;;  %v432_v14 = vrot.slane %v1038_v8, 6  ;;  %v433_v17 = vrot.slane %v1038_v8, 7  ;;  %v342_v44 = vld [vmem:[#allocation3 + $0x38] sm:$0xff] }
  0x5f   :  { %v1090_v18 = vadd.f32 %v284_v49, %v283_v40  ;;  %v343_v20 = vsel %vm1286_vm1, %v335_v57, 0.0  ;;  %v298_v23 = vrot.slane %v1077_v53, 1  ;;  %v305_v24 = vrot.slane %v1079_v54, 1 }
  0x60   :  { %v312_v25 = vrot.slane %v1081_v55, 1  ;;  %v331_v26 = vrot.slane %v330_v56, 2  ;;  %v325_v29 = vadd.f32 %v324_v59, %v323_v47  ;;  %v344_v30 = vrot.slane %v343_v20, 4 }
  0x61   :  { %v350_v31 = vsel %vm1286_vm1, %v336_v12, 0.0  ;;  %v357_v32 = vsel %vm1286_vm1, %v337_v13, 0.0  ;;  %v292_v33 = vadd.f32 %v291_v6, %v290_v50  ;;  %v319_v34 = vrot.slane %v1086_v11, 1 }
  0x62   :  { %v351_v36 = vrot.slane %v350_v31, 4  ;;  %v358_v37 = vrot.slane %v357_v32, 4  ;;  %v345_v38 = vadd.f32 %v344_v30, %v343_v20  ;;  %v364_v39 = vsel %vm1286_vm1, %v338_v19, 0.0 }
  0x63   :  { %v371_v40 = vsel %vm1286_vm1, %v339_v27, 0.0  ;;  %v378_v41 = vsel %vm1286_vm1, %v340_v28, 0.0  ;;  %v332_v43 = vadd.f32 %v331_v26, %v330_v56  ;;  %v365_v47 = vrot.slane %v364_v39, 4 }
  0x64   :  { %v352_v45 = vadd.f32 %v351_v36, %v350_v31  ;;  %v359_v46 = vadd.f32 %v358_v37, %v357_v32  ;;  %v346_v48 = vrot.slane %v345_v38, 2  ;;  %v372_v49 = vrot.slane %v371_v40, 4 }
  0x65   :  { %v379_v50 = vrot.slane %v378_v41, 4  ;;  %v385_v51 = vsel %vm1286_vm1, %v341_v35, 0.0  ;;  %v366_v6 = vadd.f32 %v365_v47, %v364_v39  ;;  %v392_v27 = vsel %vm1286_vm1, %v342_v44, 0.0 }
  0x66   :  { %v353_v57 = vrot.slane %v352_v45, 2  ;;  %v360_v59 = vrot.slane %v359_v46, 2  ;;  %v386_v12 = vrot.slane %v385_v51, 4  ;;  %v347_v13 = vadd.f32 %v346_v48, %v345_v38 }
  0x67   :  { %v373_v19 = vadd.f32 %v372_v49, %v371_v40  ;;  %v380_v20 = vadd.f32 %v379_v50, %v378_v41  ;;  %v326_v28 = vrot.slane %v325_v29, 1  ;;  %v333_v56 = vrot.slane %v332_v43, 1 }
  0x68   :  { %v367_v26 = vrot.slane %v366_v6, 2  ;;  %v387_v30 = vadd.f32 %v386_v12, %v385_v51  ;;  %v354_v31 = vadd.f32 %v353_v57, %v352_v45  ;;  %v393_v37 = vrot.slane %v392_v27, 4 }
  0x69   :  { %v374_v32 = vrot.slane %v373_v19, 2  ;;  %v381_v36 = vrot.slane %v380_v20, 2  ;;  %v348_v22 = vrot.slane %v347_v13, 1  ;;  %v361_v21 = vadd.f32 %v360_v59, %v359_v46 }
  0x6a   :  { %v368_v35 = vadd.f32 %v367_v26, %v366_v6  ;;  %v388_v5 = vrot.slane %v387_v30, 2  ;;  %v299_v39 = vadd.f32 %v298_v23, %v1077_v53  ;;  %v394_v40 = vadd.f32 %v393_v37, %v392_v27 }
  0x6b   :  { %v375_v47 = vadd.f32 %v374_v32, %v373_v19  ;;  %v382_v38 = vadd.f32 %v381_v36, %v380_v20  ;;  %v306_v41 = vadd.f32 %v305_v24, %v1079_v54  ;;  %v313_v44 = vadd.f32 %v312_v25, %v1081_v55 }
  0x6c   :  { %v320_v48 = vadd.f32 %v319_v34, %v1086_v11  ;;  %v389_v49 = vadd.f32 %v388_v5, %v387_v30  ;;  %v327_v45 = vadd.f32 %v326_v28, %v325_v29  ;;  %v334_v50 = vadd.f32 %v333_v56, %v332_v43 }
  0x6d   :  { %v355_v51 = vrot.slane %v354_v31, 1  ;;  %v395_v57 = vrot.slane %v394_v40, 2  ;;  %v349_v12 = vadd.f32 %v348_v22, %v347_v13  ;;  %v362_v46 = vrot.slane %v361_v21, 1 }
  0x6e   :  { %v369_v59 = vrot.slane %v368_v35, 1  ;;  %v376_v6 = vrot.slane %v375_v47, 1  ;;  %v383_v26 = vrot.slane %v382_v38, 1  ;;  %v390_v53 = vrot.slane %v389_v49, 1 }
  0x6f   :  { %v396_v23 = vadd.f32 %v395_v57, %v394_v40  ;;  %v416_v19 = vadd.f32 %v1036_v58, %v1090_v18  ;;  %v417_v54 = vadd.f32 %v401_v2, %v292_v33  ;;  %v418_v5 = vadd.f32 %v402_v3, %v299_v39 }
  0x70   :  { %v419_v55 = vadd.f32 %v403_v4, %v306_v41  ;;  %v420_v11 = vadd.f32 %v404_v7, %v313_v44  ;;  %v421_v24 = vadd.f32 %v405_v9, %v320_v48  ;;  %v422_v25 = vadd.f32 %v406_v10, %v327_v45 }
  0x71   :  { %v397_v22 = vrot.slane %v396_v23, 1  ;;  %v423_v18 = vadd.f32 %v407_v15, %v334_v50  ;;  %v356_v2 = vadd.f32 %v355_v51, %v354_v31  ;;  %v363_v29 = vadd.f32 %v362_v46, %v361_v21 }
  0x72   :  { %v370_v33 = vadd.f32 %v369_v59, %v368_v35  ;;  %v377_v3 = vadd.f32 %v376_v6, %v375_v47  ;;  %v384_v34 = vadd.f32 %v383_v26, %v382_v38  ;;  %v391_v43 = vadd.f32 %v390_v53, %v389_v49 }
  0x73   :  { %v398_v4 = vadd.f32 %v397_v22, %v396_v23  ;;  %v450_v13 = vmul.f32 0.125, %v416_v19  ;;  %v451_v20 = vmul.f32 0.125, %v417_v54  ;;  %v452_v7 = vmul.f32 0.125, %v418_v5 }
  0x74   :  { %v453_v27 = vmul.f32 0.125, %v419_v55  ;;  %v454_v28 = vmul.f32 0.125, %v420_v11  ;;  %v442_v9 = vsub.f32 %v349_v12, %v1038_v8  ;;  %v455_v56 = vmul.f32 0.125, %v421_v24 }
  0x75   :  { %v456_v30 = vmul.f32 0.125, %v422_v25  ;;  %v457_v10 = vmul.f32 0.125, %v423_v18  ;;  %v443_v58 = vsub.f32 %v356_v2, %v427_v16  ;;  %v444_v15 = vsub.f32 %v363_v29, %v428_v52 }
  0x76   :  { %v445_v21 = vsub.f32 %v370_v33, %v429_v60  ;;  %v446_v31 = vsub.f32 %v377_v3, %v430_v61  ;;  %v447_v32 = vsub.f32 %v384_v34, %v431_v1  ;;  %v448_v36 = vsub.f32 %v391_v43, %v432_v14 }
  0x77   :  { %v449_v37 = vsub.f32 %v398_v4, %v433_v17  ;;  %v482_v35 = vmul.f32 %v450_v13, %v450_v13  ;;  %v483_v16 = vmul.f32 %v451_v20, %v451_v20  ;;  %v484_v39 = vmul.f32 %v452_v7, %v452_v7 }
  0x78   :  { %v485_v47 = vmul.f32 %v453_v27, %v453_v27  ;;  %v486_v52 = vmul.f32 %v454_v28, %v454_v28  ;;  %v487_v38 = vmul.f32 %v455_v56, %v455_v56  ;;  %v488_v40 = vmul.f32 %v456_v30, %v456_v30 }
  0x79   :  { %v489_v60 = vmul.f32 %v457_v10, %v457_v10  ;;  %v490_v41 = vmul.f32 8.0, %v482_v35  ;;  %v491_v44 = vmul.f32 8.0, %v483_v16  ;;  %v492_v61 = vmul.f32 8.0, %v484_v39 }
  0x7a   :  { %v493_v48 = vmul.f32 8.0, %v485_v47  ;;  %v494_v49 = vmul.f32 8.0, %v486_v52  ;;  %v495_v1 = vmul.f32 8.0, %v487_v38  ;;  %v496_v45 = vmul.f32 8.0, %v488_v40 }
  0x7b   :  { %v497_v50 = vmul.f32 8.0, %v489_v60  ;;  %v498_v14 = vsub.f32 %v442_v9, %v490_v41  ;;  %v465_v8 = vrot.slane %v1028_v42, 7  ;;  %v499_v17 = vsub.f32 %v443_v58, %v491_v44 }
  0x7c   :  { %v500_v51 = vsub.f32 %v444_v15, %v492_v61  ;;  %v501_v57 = vsub.f32 %v445_v21, %v493_v48  ;;  %v475_v12 = vadd.f32 %v459_v62, %v451_v20  ;;  %v502_v46 = vsub.f32 %v446_v31, %v494_v49 }
  0x7d   :  { %v503_v59 = vsub.f32 %v447_v32, %v495_v1  ;;  %v506_v6 = vmul.f32 0.14285715, %v498_v14  ;;  %v476_v26 = vadd.f32 %v460_v63, %v452_v7  ;;  %v477_v53 = vadd.f32 %v461_v0, %v453_v27 }
  0x7e   :  { %v507_v23 = vmul.f32 0.14285715, %v499_v17  ;;  %v508_v19 = vmul.f32 0.14285715, %v500_v51  ;;  %v474_v54 = vadd.f32 %v450_v13, %v1028_v42  ;;  %v1292_v5 = vrot.slane %v1028_v42, 4 }
  0x7f   :  { %v504_v11 = vsub.f32 %v448_v36, %v496_v45  ;;  %v505_v22 = vsub.f32 %v449_v37, %v497_v50  ;;  %v1293_v62 = vrot.slane %v1028_v42, 5  ;;  %v1294_v25 = vrot.slane %v1028_v42, 6 }
  0x80   :  { %v478_v55 = vadd.f32 %v1292_v5, %v454_v28  ;;  %v509_v2 = vmul.f32 0.14285715, %v501_v57  ;;  %v1155_v63 = vmax.f32 %v506_v6, 0.0  ;;  %v481_v29 = vadd.f32 %v465_v8, %v457_v10 }
  0x81   :  { %v479_v24 = vadd.f32 %v1293_v62, %v455_v56  ;;  %v480_v18 = vadd.f32 %v1294_v25, %v456_v30  ;;  %v510_v0 = vmul.f32 0.14285715, %v502_v46  ;;  %v511_v33 = vmul.f32 0.14285715, %v503_v59 }
  0x82   :  { %v1157_v3 = vmax.f32 %v507_v23, 0.0  ;;  %v1159_v34 = vmax.f32 %v508_v19, 0.0  ;;  %v695_v43 = vrot.slane %v475_v12, 7  ;;  %v697_v4 = vrot.slane %v476_v26, 6 }
  0x83   :  { %v699_v13 = vrot.slane %v477_v53, 5  ;;  %v512_v20 = vmul.f32 0.14285715, %v504_v11  ;;  %v513_v7 = vmul.f32 0.14285715, %v505_v22  ;;  %v701_v27 = vrot.slane %v478_v55, 4 }
  0x84   :  { %v1161_v28 = vmax.f32 %v509_v2, 0.0  ;;  %v696_v42 = vsel %vm64_vm2, %v695_v43, %v474_v54  ;;  %v703_v9 = vrot.slane %v479_v24, 3  ;;  %863 = vrsqrt.f32 %v1155_v63 }
  0x85   :  { %v1165_v56 = vmax.f32 %v510_v0, 0.0  ;;  %v698_v30 = vsel %vm67_vm3, %v697_v4, %v696_v42  ;;  %v705_v10 = vrot.slane %v480_v18, 2  ;;  %865 = vrsqrt.f32 %v1157_v3 }
  0x86   :  { %v1169_v58 = vmax.f32 %v511_v33, 0.0  ;;  %v700_v15 = vsel %vm1291_vm4, %v699_v13, %v698_v30  ;;  %v707_v21 = vrot.slane %v481_v29, 1  ;;  %867 = vrsqrt.f32 %v1159_v34 }
  0x87   :  { %v1173_v31 = vmax.f32 %v512_v20, 0.0  ;;  %v702_v32 = vsel %vm1290_vm5, %v701_v27, %v700_v15  ;;  %v1176_v36 = vmax.f32 %v513_v7, 0.0  ;;  %869 = vrsqrt.f32 %v1161_v28 }
  0x88   :  { %v704_v37 = vsel %vm1289_vm6, %v703_v9, %v702_v32  ;;  %871 = vrsqrt.f32 %v1165_v56  ;;  %vm524_vm9 = vcmp.eq.f32.partialorder %v1155_v63, inf  ;;  %vm526_vm10 = vcmp.eq.f32.partialorder %v1155_v63, 0.0 }
  0x89   :  { %v706_v35 = vsel %vm1288_vm7, %v705_v10, %v704_v37  ;;  %873 = vrsqrt.f32 %v1169_v58  ;;  %v527_v39 = vand.u32 2147483648, %v1155_v63  ;;  %vm531_vm11 = vcmp.eq.f32.partialorder %v1157_v3, inf }
  0x8a   :  { %v708_v16 = vsel %vm1287_vm8, %v707_v21, %v706_v35  ;;  %875 = vrsqrt.f32 %v1173_v31  ;;  %vm533_vm12 = vcmp.eq.f32.partialorder %v1157_v3, 0.0  ;;  %v534_v47 = vand.u32 2147483648, %v1157_v3  ;;  %v808_v21 = vld [vmem:[%s1284_s2] ss:$0 sm:$0xff] }
  0x8b   :  { %839 = vmatmul.mubr.msk.f32.vlgmr.msra.gmra.mrb[0].mxu1 %vm1286_vm1, %v708_v16  ;;  %877 = vrsqrt.f32 %v1176_v36  ;;  %vm538_vm13 = vcmp.eq.f32.partialorder %v1159_v34, inf  ;;  %vm540_vm14 = vcmp.eq.f32.partialorder %v1159_v34, 0.0  ;;  %v541_v38 = vand.u32 2147483648, %v1159_v34 }
  0x8c   :  { %vm545_vm15 = vcmp.eq.f32.partialorder %v1161_v28, inf  ;;  %vm547_vm0 = vcmp.eq.f32.partialorder %v1161_v28, 0.0  ;;  %v548_v41 = vand.u32 2147483648, %v1161_v28  ;;  %vm552_vm1 = vcmp.eq.f32.partialorder %v1165_v56, inf }
  0x8d   :  { %vm554_vm8 = vcmp.eq.f32.partialorder %v1165_v56, 0.0  ;;  %v555_v48 = vand.u32 2147483648, %v1165_v56  ;;  %vm559_vm7 = vcmp.eq.f32.partialorder %v1169_v58, inf  ;;  %v562_v45 = vand.u32 2147483648, %v1169_v58 }
  0x8e   :  { %v864_v52 = vpop.eup %863  ;;  %vm566_vm5 = vcmp.eq.f32.partialorder %v1173_v31, inf  ;;  %vm568_vm4 = vcmp.eq.f32.partialorder %v1173_v31, 0.0  ;;  %v569_v8 = vand.u32 2147483648, %v1173_v31  ;;  %vm573_vm6 = vcmp.eq.f32.partialorder %v1176_v36, inf }
  0x8f   :  { %v866_v40 = vpop.eup %865  ;;  %v523_v60 = vmul.f32 %v864_v52, %v1155_v63  ;;  %v576_v5 = vand.u32 2147483648, %v1176_v36 }
  0x90   :  { %v868_v44 = vpop.eup %867  ;;  %v530_v61 = vmul.f32 %v866_v40, %v1157_v3 }
  0x91   :  { %v525_v49 = vsel %vm524_vm9, %v1155_v63, %v523_v60  ;;  %v537_v1 = vmul.f32 %v868_v44, %v1159_v34  ;;  %v870_v50 = vpop.eup %869  ;;  %vm575_vm9 = vcmp.eq.f32.partialorder %v1176_v36, 0.0 }
  0x92   :  { %v532_v14 = vsel %vm531_vm11, %v1157_v3, %v530_v61  ;;  %v872_v17 = vpop.eup %871  ;;  %v528_v51 = vsel %vm526_vm10, %v527_v39, %v525_v49  ;;  %v544_v46 = vmul.f32 %v870_v50, %v1161_v28  ;;  %vm1295_vm10 = vcmp.eq.f32.partialorder %v1169_v58, 0.0 }
  0x93   :  { %v535_v57 = vsel %vm533_vm12, %v534_v47, %v532_v14  ;;  %v539_v12 = vsel %vm538_vm13, %v1159_v34, %v537_v1  ;;  %v874_v59 = vpop.eup %873  ;;  %v551_v26 = vmul.f32 %v872_v17, %v1165_v56 }
  0x94   :  { %v542_v6 = vsel %vm540_vm14, %v541_v38, %v539_v12  ;;  %v594_v53 = vrot.slane %v535_v57, 7  ;;  %v876_v23 = vpop.eup %875  ;;  %v546_v19 = vsel %vm545_vm15, %v1161_v28, %v544_v46  ;;  %v558_v54 = vmul.f32 %v874_v59, %v1169_v58 }
  0x95   :  { %v597_v55 = vrot.slane %v542_v6, 6  ;;  %v878_v11 = vpop.eup %877  ;;  %v549_v22 = vsel %vm547_vm0, %v548_v41, %v546_v19  ;;  %v553_v62 = vsel %vm552_vm1, %v1165_v56, %v551_v26  ;;  %v565_v24 = vmul.f32 %v876_v23, %v1173_v31 }
  0x96   :  { %v596_v25 = vsel %vm64_vm2, %v594_v53, %v528_v51  ;;  %v556_v18 = vsel %vm554_vm8, %v555_v48, %v553_v62  ;;  %v560_v2 = vsel %vm559_vm7, %v1169_v58, %v558_v54  ;;  %v572_v63 = vmul.f32 %v878_v11, %v1176_v36 }
  0x97   :  { %v599_v29 = vsel %vm67_vm3, %v597_v55, %v596_v25  ;;  %v563_v0 = vsel %vm1295_vm10, %v562_v45, %v560_v2  ;;  %v567_v33 = vsel %vm566_vm5, %v1173_v31, %v565_v24  ;;  %v600_v3 = vrot.slane %v549_v22, 5 }
  0x98   :  { %v603_v34 = vrot.slane %v556_v18, 4  ;;  %v570_v43 = vsel %vm568_vm4, %v569_v8, %v567_v33  ;;  %v574_v4 = vsel %vm573_vm6, %v1176_v36, %v572_v63  ;;  %v606_v13 = vrot.slane %v563_v0, 3 }
  0x99   :  { %v577_v20 = vsel %vm575_vm9, %v576_v5, %v574_v4  ;;  %vm1296_vm1 = vcmask 1043459   ;;  %v609_v27 = vrot.slane %v570_v43, 2  ;;  %vm1297_vm2 = vcmask 1044484  }
  0x9a   :  { %v602_v7 = vsel %vm1296_vm1, %v600_v3, %v599_v29  ;;  %v612_v42 = vrot.slane %v577_v20, 1  ;;  %vm1298_vm3 = vcmask 1045509   ;;  %vm1299_vm5 = vcmask 1046534  }
  0x9b   :  { %v605_v28 = vsel %vm1297_vm2, %v603_v34, %v602_v7  ;;  %vm1300_vm7 = vcmask 1047559   ;;  %vm1301_vm4 = vcmask 261120  }
  0x9c   :  { %v608_v9 = vsel %vm1298_vm3, %v606_v13, %v605_v28 }
  0x9d   :  { %v611_v56 = vsel %vm1299_vm5, %v609_v27, %v608_v9 }
  0x9e   :  { %v614_v30 = vsel %vm1300_vm7, %v612_v42, %v611_v56 }
  0x9f   :  { %828 = vmatmul.mubr.msk.f32.vlgmr.msra.gmra.mrb[0].mxu0 %vm1301_vm4, %v614_v30 }
 0x15e   :  { %v777_v10 = vpop.f32.mrb[0].mxu1 }
 0x15f   :  { %v840_v58 = vpop.f32.mrb[1].mxu1 }
 0x172   :  { %v683_v15 = vpop.f32.mrb[0].mxu0 }
 0x173   :  { %v778_v31 = vadd.f32 %v777_v10, %v683_v15  ;;  %v829_v32 = vpop.f32.mrb[1].mxu0 }
 0x175   :  { %v788_v36 = vadd.f32 %v808_v21, %v778_v31 }
 0x177   :  { %789 = vst [vmem:[#allocation10] sm:$0xff] %v788_v36 }
 0x178   :  { %934 = shalt.err (!%p931_p6)
}
 0x179   :  { %s935_s16 = scalar_lea.hbm %s1285_s3, 128 }
 0x17a   :  { %p936_p7 = scmp.ne.s32.totalorder %s1285_s3, %s935_s16  ;;  %p939_p8 = scmp.lt.u32.totalorder %s935_s16, %s1285_s3 }
 0x17c   :  { %p941_p9 = pnand %p939_p8, %p936_p7 }
 0x17e   :  { %944 = shalt.err (!%p941_p9)
}
 0x17f   :  { %799 = dma.vmem_to_hbm [thread:$0]  %s797_s12, 128, %s1285_s3, [#allocation7]  }
 0x180   :  { %949 = dma.done.wait [#allocation7], 128  }
 0x181   :  { %950 = vsyncadd [#allocation7], 4294967168 }
 0x182   :  { %803 = vsyncpa [#allocation6], 1 }
 0x183   :  { %804 = vsyncpa [#allocation9], 1 }
 0x184   :  { %805 = vsyncpa [#allocation7], 1 }

// kernel: tpu_custom_call.1
= control target key start
LH: loop header
LB: loop body
LE: loop exit
PB: predicated region body
PF: predicated region fallthrough
CT: control target
= control target key end

     0   :  { %8 = vsyncpa [#allocation6], 0  ;;  %s1282_s0 = inlined_call_operand.hbm [shape: f32[8,8,32], index: 0, kind: input, shape index: {}]   ;;  %s1283_s1 = inlined_call_operand.hbm [shape: f32[64,128], index: 1, kind: input, shape index: {}]   ;;  %s1284_s2 = inlined_call_operand.vmem [shape: f32[1,128], index: 2, kind: input, shape index: {}]   ;;  %s1285_s3 = inlined_call_operand.hbm [shape: f32[8,128], index: 3, kind: output, shape index: {}]  }
   0x1   :  { %9 = vsyncpa [#allocation9], 0 }
   0x2   :  { %10 = vsyncpa [#allocation7], 0  ;;  %s951_s12 = smov [#allocation5]   ;;  %s879_s16 = scalar_lea.hbm %s1282_s0, 1024 }
   0x3   :  { %s16_s13 = sshll.u32 %s951_s12, 4  ;;  %p880_p0 = scmp.ne.s32.totalorder %s1282_s0, %s879_s16  ;;  %s17_s13 = int_to_ptr.vmem [resolvable:$true] %s16_s13 }
   0x4   :  { %p883_p1 = scmp.lt.u32.totalorder %s879_s16, %s1282_s0 }
   0x6   :  { %p885_p2 = pnand %p883_p1, %p880_p0 }
   0x8   :  { %888 = shalt.err (!%p885_p2)
}
   0x9   :  { %s889_s21 = scalar_lea.vmem %s17_s13, 1024  ;;  %p894_p4 = scmp.lt.s32.totalorder %s17_s13, %s17_s13 }
   0xa   :  { %p890_p3 = scmp.ne.s32.totalorder %s17_s13, %s889_s21  ;;  %p895_p5 = scmp.lt.s32.totalorder %s889_s21, %s889_s21 }
   0xc   :  { %p896_p6 = por %p895_p5, %p894_p4 }
   0xe   :  { %p897_p7 = pnand %p896_p6, %p890_p3 }
  0x10   :  { %900 = shalt.err (!%p897_p7)
}
  0x11   :  { %s952_s22 = smov 128   ;;  %s953_s23 = smov 8  }
  0x12   :  { %22 = dma.hbm_to_vmem [thread:$0]  %s1282_s0, 1024, %s17_s13, [#allocation6], %s952_s22, %s952_s22, %s953_s23  }
  0x13   :  { %s954_s26 = smov [#allocation8]   ;;  %s901_s30 = scalar_lea.hbm %s1283_s1, 1024 }
  0x14   :  { %s28_s27 = sshll.u32 %s954_s26, 4  ;;  %p902_p8 = scmp.ne.s32.totalorder %s1283_s1, %s901_s30  ;;  %s29_s27 = int_to_ptr.vmem [resolvable:$true] %s28_s27 }
  0x15   :  { %p905_p9 = scmp.lt.u32.totalorder %s901_s30, %s1283_s1 }
  0x17   :  { %p907_p10 = pnand %p905_p9, %p902_p8 }
  0x19   :  { %910 = shalt.err (!%p907_p10)
}
  0x1a   :  { %s911_s8 = scalar_lea.vmem %s29_s27, 1024  ;;  %p916_p12 = scmp.lt.s32.totalorder %s29_s27, %s29_s27 }
  0x1b   :  { %p912_p11 = scmp.ne.s32.totalorder %s29_s27, %s911_s8  ;;  %p917_p13 = scmp.lt.s32.totalorder %s911_s8, %s911_s8 }
  0x1d   :  { %p918_p0 = por %p917_p13, %p916_p12 }
  0x1f   :  { %p919_p1 = pnand %p918_p0, %p912_p11 }
  0x21   :  { %922 = shalt.err (!%p919_p1)
}
  0x22   :  { %34 = dma.hbm_to_vmem [thread:$0]  %s1283_s1, 1024, %s29_s27, [#allocation9], %s952_s22, %s952_s22, %s953_s23  }
  0x23   :  { %945 = dma.done.wait [#allocation6], 1024  }
  0x24   :  { %946 = vsyncadd [#allocation6], 4294966272 }
  0x25   :  { %947 = dma.done.wait [#allocation9], 1024  }
  0x26   :  { %948 = vsyncadd [#allocation9], 4294966272  ;;  %v955_v0 = vmov 0.0|0.0   ;;  %vm956_vm0 = vmmov 0   ;;  %v957_v1 = vmov 0.0   ;;  %vm1286_vm1 = vcmask 261120  }
  0x27   :  { %847 = vmatprep.subr.bf16.mxu1 %v955_v0  ;;  %841 = vmatprep.subr.bf16.mxu0 %v955_v0  ;;  %87 = vst.msk [vmem:[#allocation2] sm:$0xff] %vm1286_vm1, %v957_v1  ;;  %88 = vst.msk [vmem:[#allocation2 + $0x8] sm:$0xff] %vm1286_vm1, %v957_v1  ;;  %v578_v2 = vld [vmem:[#allocation8] sm:$0xff]  ;;  %v579_v3 = vld [vmem:[#allocation8 + $0x8] sm:$0xff]  ;;  %vm64_vm2 = vcmask 1041409   ;;  %vm67_vm3 = vcmask 1042434   ;;  %v109_v35 = vlaneseq }
  0x28   :  { %838 = vmatprep.mubr.msk.f32.mxu1 %vm956_vm0, %v957_v1  ;;  %827 = vmatprep.mubr.msk.f32.mxu0 %vm956_vm0, %v957_v1  ;;  %89 = vst.msk [vmem:[#allocation2 + $0x10] sm:$0xff] %vm1286_vm1, %v957_v1  ;;  %90 = vst.msk [vmem:[#allocation2 + $0x18] sm:$0xff] %vm1286_vm1, %v957_v1  ;;  %v582_v4 = vld [vmem:[#allocation8 + $0x20] sm:$0xff]  ;;  %v848_v5 = vpack.c.bf16 %v579_v3, %v578_v2  ;;  %v583_v6 = vld [vmem:[#allocation8 + $0x28] sm:$0xff]  ;;  %vm1291_vm4 = vcmask 1043459   ;;  %vm1290_vm5 = vcmask 1044484  }
  0x29   :  { %91 = vst.msk [vmem:[#allocation2 + $0x20] sm:$0xff] %vm1286_vm1, %v957_v1  ;;  %92 = vst.msk [vmem:[#allocation2 + $0x28] sm:$0xff] %vm1286_vm1, %v957_v1  ;;  %v580_v7 = vld [vmem:[#allocation8 + $0x10] sm:$0xff]  ;;  %v581_v8 = vld [vmem:[#allocation8 + $0x18] sm:$0xff]  ;;  %v842_v9 = vpack.c.bf16 %v583_v6, %v582_v4  ;;  %vm1289_vm6 = vcmask 1045509   ;;  %vm1288_vm7 = vcmask 1046534  }
  0x2a   :  { %93 = vst.msk [vmem:[#allocation2 + $0x30] sm:$0xff] %vm1286_vm1, %v957_v1  ;;  %94 = vst.msk [vmem:[#allocation2 + $0x38] sm:$0xff] %vm1286_vm1, %v957_v1  ;;  %v584_v10 = vld [vmem:[#allocation8 + $0x30] sm:$0xff]  ;;  %v585_v11 = vld [vmem:[#allocation8 + $0x38] sm:$0xff]  ;;  %849 = vmatpush3.bf16.msra.mxu1 %v848_v5  ;;  %v851_v12 = vpack.c.bf16 %v581_v8, %v580_v7  ;;  %vm1287_vm8 = vcmask 1047559   ;;  %v110_v40 = vshrl.u32 %v109_v35, 7 }
  0x2b   :  { %95 = vst.msk [vmem:[#allocation3] sm:$0xff] %vm1286_vm1, %v957_v1  ;;  %96 = vst.msk [vmem:[#allocation3 + $0x8] sm:$0xff] %vm1286_vm1, %v957_v1  ;;  %v48_v13 = vld [vmem:[#allocation5 + $0x8] sm:$0x1]  ;;  %v49_v14 = vld [vmem:[#allocation5 + $0x10] sm:$0x1]  ;;  %843 = vmatpush3.bf16.msra.mxu0 %v842_v9  ;;  %850 = vmatprep.subr.bf16.mxu1 %v955_v0  ;;  %v845_v16 = vpack.c.bf16 %v585_v11, %v584_v10 }
  0x2c   :  { %97 = vst.msk [vmem:[#allocation3 + $0x10] sm:$0xff] %vm1286_vm1, %v957_v1  ;;  %98 = vst.msk [vmem:[#allocation3 + $0x18] sm:$0xff] %vm1286_vm1, %v957_v1  ;;  %v50_v15 = vld [vmem:[#allocation5 + $0x18] sm:$0x1]  ;;  %v47_v17 = vld [vmem:[#allocation5] sm:$0x1]  ;;  %844 = vmatprep.subr.bf16.mxu0 %v955_v0 }
  0x2d   :  { %99 = vst.msk [vmem:[#allocation3 + $0x20] sm:$0xff] %vm1286_vm1, %v957_v1  ;;  %100 = vst.msk [vmem:[#allocation3 + $0x28] sm:$0xff] %vm1286_vm1, %v957_v1  ;;  %v51_v18 = vld [vmem:[#allocation5 + $0x20] sm:$0x1]  ;;  %v52_v19 = vld [vmem:[#allocation5 + $0x28] sm:$0x1] }
  0x2e   :  { %101 = vst.msk [vmem:[#allocation3 + $0x30] sm:$0xff] %vm1286_vm1, %v957_v1  ;;  %102 = vst.msk [vmem:[#allocation3 + $0x38] sm:$0xff] %vm1286_vm1, %v957_v1  ;;  %v53_v20 = vld [vmem:[#allocation5 + $0x30] sm:$0x1]  ;;  %v63_v21 = vrot.slane %v48_v13, 7  ;;  %v66_v22 = vrot.slane %v49_v14, 6  ;;  %852 = vmatpush3.bf16.msra.mxu1 %v851_v12 }
  0x2f   :  { %v69_v23 = vrot.slane %v50_v15, 5  ;;  %v54_v24 = vld [vmem:[#allocation5 + $0x38] sm:$0x1]  ;;  %v72_v25 = vrot.slane %v51_v18, 4  ;;  %v75_v27 = vrot.slane %v52_v19, 3  ;;  %846 = vmatpush3.bf16.msra.mxu0 %v845_v16  ;;  %v78_v29 = vrot.slane %v53_v20, 2 }
  0x30   :  { %v65_v26 = vsel %vm64_vm2, %v63_v21, %v47_v17  ;;  %v81_v31 = vrot.slane %v54_v24, 1  ;;  %v958_v33 = vmov 1966171168   ;;  %v156_v48 = vsub.s32 0, %v110_v40  ;;  %v194_v54 = vld [vmem:[#allocation5] sm:$0xff]  ;;  %v195_v56 = vld [vmem:[#allocation5 + $0x8] sm:$0xff] }
  0x31   :  { %v68_v28 = vsel %vm67_vm3, %v66_v22, %v65_v26  ;;  %v107_v34 = vunpack.c.l.s4 %v958_v33  ;;  %v196_v57 = vld [vmem:[#allocation5 + $0x10] sm:$0xff]  ;;  %v197_v63 = vld [vmem:[#allocation5 + $0x18] sm:$0xff]  ;;  %v198_v0 = vld [vmem:[#allocation5 + $0x20] sm:$0xff]  ;;  %s959_s11 = smov [#allocation10]  }
  0x32   :  { %v71_v30 = vsel %vm1291_vm4, %v69_v23, %v68_v28  ;;  %v210_v1 = vld [vmem:[#allocation2] sm:$0xff]  ;;  %v199_v4 = vld [vmem:[#allocation5 + $0x28] sm:$0xff]  ;;  %v200_v5 = vld [vmem:[#allocation5 + $0x30] sm:$0xff]  ;;  %s796_s12 = sshll.u32 %s959_s11, 4  ;;  %s797_s12 = int_to_ptr.vmem [resolvable:$true] %s796_s12 }
  0x33   :  { %v74_v32 = vsel %vm1290_vm5, %v72_v25, %v71_v30  ;;  %v108_v39 = vunpack.c.0.s8 %v107_v34  ;;  %v201_v6 = vld [vmem:[#allocation5 + $0x38] sm:$0xff]  ;;  %v211_v13 = vld [vmem:[#allocation2 + $0x8] sm:$0xff]  ;;  %v212_v14 = vld [vmem:[#allocation2 + $0x10] sm:$0xff]  ;;  %s923_s13 = scalar_lea.vmem %s797_s12, 128  ;;  %p928_p3 = scmp.lt.s32.totalorder %s797_s12, %s797_s12 }
  0x34   :  { %v77_v36 = vsel %vm1289_vm6, %v75_v27, %v74_v32  ;;  %v214_v15 = vld [vmem:[#allocation2 + $0x20] sm:$0xff]  ;;  %v213_v19 = vld [vmem:[#allocation2 + $0x18] sm:$0xff]  ;;  %v215_v20 = vld [vmem:[#allocation2 + $0x28] sm:$0xff]  ;;  %p924_p2 = scmp.ne.s32.totalorder %s797_s12, %s923_s13  ;;  %p929_p4 = scmp.lt.s32.totalorder %s923_s13, %s923_s13 }
  0x35   :  { %v80_v37 = vsel %vm1288_vm7, %v78_v29, %v77_v36  ;;  %v111_v41 = vsub.s32 %v108_v39, %v110_v40  ;;  %v216_v21 = vld [vmem:[#allocation2 + $0x30] sm:$0xff]  ;;  %v217_v27 = vld [vmem:[#allocation2 + $0x38] sm:$0xff]  ;;  %v236_v32 = vld [vmem:[#allocation3 + $0x8] sm:$0xff] }
  0x36   :  { %v83_v38 = vsel %vm1287_vm8, %v81_v31, %v80_v37  ;;  %v235_v31 = vld [vmem:[#allocation3] sm:$0xff]  ;;  %v238_v39 = vld [vmem:[#allocation3 + $0x18] sm:$0xff]  ;;  %p930_p5 = por %p929_p4, %p928_p3 }
  0x37   :  { %86 = vst.msk [vmem:[#allocation4] sm:$0xff] %vm1286_vm1, %v83_v38  ;;  %v237_v38 = vld [vmem:[#allocation3 + $0x10] sm:$0xff]  ;;  %v239_v40 = vld [vmem:[#allocation3 + $0x20] sm:$0xff] }
  0x38   :  { %p931_p6 = pnand %p930_p5, %p924_p2 }
  0x3e   :  { %v1028_v42 = vld [vmem:[#allocation4] sm:$0xff] }
  0x3f   :  { %v105_v43 = vcombine.high %v1028_v42, %v1028_v42  ;;  %v112_v44 = vrot.slane %v1028_v42, %v111_v41  ;;  %v424_v49 = vmul.f32 %v1028_v42, %v1028_v42  ;;  %v1036_v58 = vmul.f32 0.0, %v1028_v42 }
  0x41   :  { %v119_v45 = vrot.slane %v105_v43, %v111_v41  ;;  %v120_v46 = vcombine.high %v112_v44, %v112_v44  ;;  %v128_v47 = vrot.slane %v112_v44, %v111_v41  ;;  %v1038_v8 = vmul.f32 0.0, %v424_v49  ;;  %v241_v43 = vld [vmem:[#allocation3 + $0x30] sm:$0xff]  ;;  %v242_v44 = vld [vmem:[#allocation3 + $0x38] sm:$0xff] }
  0x43   :  { %v121_v50 = vcombine.high %v119_v45, %v119_v45  ;;  %v135_v51 = vrot.slane %v119_v45, %v111_v41  ;;  %v142_v52 = vrot.slane %v120_v46, %v111_v41  ;;  %v150_v53 = vcombine.high %v128_v47, %v128_v47 }
  0x44   :  { %v157_v55 = vrot.slane %v128_v47, %v156_v48 }
  0x45   :  { %v149_v59 = vrot.slane %v121_v50, %v111_v41  ;;  %v151_v60 = vcombine.high %v135_v51, %v135_v51  ;;  %v152_v61 = vcombine.high %v142_v52, %v142_v52  ;;  %v161_v62 = vrot.slane %v142_v52, %v156_v48  ;;  %v240_v41 = vld [vmem:[#allocation3 + $0x28] sm:$0xff] }
  0x46   :  { %v165_v2 = vrot.slane %v150_v53, %v156_v48  ;;  %v173_v3 = vrot.slane %v135_v51, %v156_v48  ;;  %v202_v7 = vsub.f32 %v194_v54, %v157_v55 }
  0x47   :  { %v153_v9 = vcombine.high %v149_v59, %v149_v59  ;;  %v169_v10 = vrot.slane %v152_v61, %v156_v48  ;;  %v177_v11 = vrot.slane %v149_v59, %v156_v48  ;;  %v181_v12 = vrot.slane %v151_v60, %v156_v48 }
  0x48   :  { %v203_v16 = vsub.f32 %v195_v56, %v161_v62  ;;  %v204_v17 = vsub.f32 %v196_v57, %v165_v2  ;;  %v206_v18 = vsub.f32 %v198_v0, %v173_v3  ;;  %v218_v22 = vadd.f32 %v210_v1, %v202_v7 }
  0x49   :  { %v185_v23 = vrot.slane %v153_v9, %v156_v48  ;;  %v205_v24 = vsub.f32 %v197_v63, %v169_v10  ;;  %v207_v25 = vsub.f32 %v199_v4, %v177_v11  ;;  %v208_v26 = vsub.f32 %v200_v5, %v181_v12 }
  0x4a   :  { %v219_v28 = vadd.f32 %v211_v13, %v203_v16  ;;  %v220_v29 = vadd.f32 %v212_v14, %v204_v17  ;;  %v222_v30 = vadd.f32 %v214_v15, %v206_v18  ;;  %227 = vst.msk [vmem:[#allocation2] sm:$0xff] %vm1286_vm1, %v218_v22  ;;  %v243_v33 = vmul.f32 %v202_v7, %v202_v7 }
  0x4b   :  { %v209_v34 = vsub.f32 %v201_v6, %v185_v23  ;;  %v221_v35 = vadd.f32 %v213_v19, %v205_v24  ;;  %v223_v36 = vadd.f32 %v215_v20, %v207_v25  ;;  %v224_v37 = vadd.f32 %v216_v21, %v208_v26 }
  0x4c   :  { %228 = vst.msk [vmem:[#allocation2 + $0x8] sm:$0xff] %vm1286_vm1, %v219_v28  ;;  %229 = vst.msk [vmem:[#allocation2 + $0x10] sm:$0xff] %vm1286_vm1, %v220_v29  ;;  %v244_v45 = vmul.f32 %v203_v16, %v203_v16  ;;  %v245_v46 = vmul.f32 %v204_v17, %v204_v17  ;;  %v246_v47 = vmul.f32 %v205_v24, %v205_v24  ;;  %v459_v62 = vrot.slane %v1028_v42, 1 }
  0x4d   :  { %231 = vst.msk [vmem:[#allocation2 + $0x20] sm:$0xff] %vm1286_vm1, %v222_v30  ;;  %v247_v48 = vmul.f32 %v206_v18, %v206_v18  ;;  %v225_v49 = vadd.f32 %v217_v27, %v209_v34  ;;  %230 = vst.msk [vmem:[#allocation2 + $0x18] sm:$0xff] %vm1286_vm1, %v221_v35  ;;  %v248_v50 = vmul.f32 %v207_v25, %v207_v25  ;;  %v460_v63 = vrot.slane %v1028_v42, 2 }
  0x4e   :  { %232 = vst.msk [vmem:[#allocation2 + $0x28] sm:$0xff] %vm1286_vm1, %v223_v36  ;;  %233 = vst.msk [vmem:[#allocation2 + $0x30] sm:$0xff] %vm1286_vm1, %v224_v37  ;;  %v249_v51 = vmul.f32 %v208_v26, %v208_v26  ;;  %v250_v52 = vmul.f32 %v209_v34, %v209_v34  ;;  %v251_v53 = vadd.f32 %v243_v33, %v235_v31  ;;  %v461_v0 = vrot.slane %v1028_v42, 3 }
  0x4f   :  { %v252_v54 = vadd.f32 %v244_v45, %v236_v32  ;;  %v253_v55 = vadd.f32 %v245_v46, %v237_v38  ;;  %v254_v56 = vadd.f32 %v246_v47, %v238_v39  ;;  %234 = vst.msk [vmem:[#allocation2 + $0x38] sm:$0xff] %vm1286_vm1, %v225_v49  ;;  %v255_v57 = vadd.f32 %v247_v48, %v239_v40 }
  0x50   :  { %v256_v59 = vadd.f32 %v248_v50, %v240_v41  ;;  %v257_v60 = vadd.f32 %v249_v51, %v241_v43  ;;  %v258_v61 = vadd.f32 %v250_v52, %v242_v44  ;;  %259 = vst.msk [vmem:[#allocation3] sm:$0xff] %vm1286_vm1, %v251_v53  ;;  %v401_v2 = vrot.slane %v1036_v58, 1 }
  0x51   :  { %260 = vst.msk [vmem:[#allocation3 + $0x8] sm:$0xff] %vm1286_vm1, %v252_v54  ;;  %261 = vst.msk [vmem:[#allocation3 + $0x10] sm:$0xff] %vm1286_vm1, %v253_v55  ;;  %v271_v1 = vld [vmem:[#allocation2] sm:$0xff]  ;;  %v402_v3 = vrot.slane %v1036_v58, 2  ;;  %v403_v4 = vrot.slane %v1036_v58, 3  ;;  %v404_v7 = vrot.slane %v1036_v58, 4 }
  0x52   :  { %262 = vst.msk [vmem:[#allocation3 + $0x18] sm:$0xff] %vm1286_vm1, %v254_v56  ;;  %263 = vst.msk [vmem:[#allocation3 + $0x20] sm:$0xff] %vm1286_vm1, %v255_v57  ;;  %v279_v6 = vsel %vm1286_vm1, %v271_v1, 0.0  ;;  %v405_v9 = vrot.slane %v1036_v58, 5  ;;  %v406_v10 = vrot.slane %v1036_v58, 6  ;;  %v407_v15 = vrot.slane %v1036_v58, 7 }
  0x53   :  { %264 = vst.msk [vmem:[#allocation3 + $0x28] sm:$0xff] %vm1286_vm1, %v256_v59  ;;  %265 = vst.msk [vmem:[#allocation3 + $0x30] sm:$0xff] %vm1286_vm1, %v257_v60  ;;  %v272_v11 = vld [vmem:[#allocation2 + $0x8] sm:$0xff]  ;;  %v273_v12 = vld [vmem:[#allocation2 + $0x10] sm:$0xff]  ;;  %v280_v14 = vrot.slane %v279_v6, 4  ;;  %v427_v16 = vrot.slane %v1038_v8, 1 }
  0x54   :  { %266 = vst.msk [vmem:[#allocation3 + $0x38] sm:$0xff] %vm1286_vm1, %v258_v61  ;;  %v275_v13 = vld [vmem:[#allocation2 + $0x20] sm:$0xff]  ;;  %v274_v17 = vld [vmem:[#allocation2 + $0x18] sm:$0xff]  ;;  %v286_v20 = vsel %vm1286_vm1, %v272_v11, 0.0  ;;  %v293_v21 = vsel %vm1286_vm1, %v273_v12, 0.0  ;;  %v428_v52 = vrot.slane %v1038_v8, 2 }
  0x55   :  { %v276_v18 = vld [vmem:[#allocation2 + $0x28] sm:$0xff]  ;;  %v277_v19 = vld [vmem:[#allocation2 + $0x30] sm:$0xff]  ;;  %v307_v22 = vsel %vm1286_vm1, %v275_v13, 0.0  ;;  %v281_v23 = vadd.f32 %v280_v14, %v279_v6  ;;  %v287_v24 = vrot.slane %v286_v20, 4  ;;  %v294_v25 = vrot.slane %v293_v21, 4 }
  0x56   :  { %v300_v26 = vsel %vm1286_vm1, %v274_v17, 0.0  ;;  %v278_v27 = vld [vmem:[#allocation2 + $0x38] sm:$0xff]  ;;  %v308_v29 = vrot.slane %v307_v22, 4  ;;  %v314_v30 = vsel %vm1286_vm1, %v276_v18, 0.0  ;;  %v321_v31 = vsel %vm1286_vm1, %v277_v19, 0.0 }
  0x57   :  { %v301_v28 = vrot.slane %v300_v26, 4  ;;  %v282_v32 = vrot.slane %v281_v23, 2  ;;  %v288_v33 = vadd.f32 %v287_v24, %v286_v20  ;;  %v295_v34 = vadd.f32 %v294_v25, %v293_v21  ;;  %v335_v57 = vld [vmem:[#allocation3] sm:$0xff] }
  0x58   :  { %v315_v35 = vrot.slane %v314_v30, 4  ;;  %v309_v37 = vadd.f32 %v308_v29, %v307_v22  ;;  %v322_v38 = vrot.slane %v321_v31, 4  ;;  %v328_v39 = vsel %vm1286_vm1, %v278_v27, 0.0  ;;  %v336_v12 = vld [vmem:[#allocation3 + $0x8] sm:$0xff]  ;;  %v337_v13 = vld [vmem:[#allocation3 + $0x10] sm:$0xff] }
  0x59   :  { %v302_v36 = vadd.f32 %v301_v28, %v300_v26  ;;  %v283_v40 = vadd.f32 %v282_v32, %v281_v23  ;;  %v289_v41 = vrot.slane %v288_v33, 2  ;;  %v296_v43 = vrot.slane %v295_v34, 2  ;;  %v338_v19 = vld [vmem:[#allocation3 + $0x18] sm:$0xff]  ;;  %v339_v27 = vld [vmem:[#allocation3 + $0x20] sm:$0xff] }
  0x5a   :  { %v316_v44 = vadd.f32 %v315_v35, %v314_v30  ;;  %v310_v46 = vrot.slane %v309_v37, 2  ;;  %v323_v47 = vadd.f32 %v322_v38, %v321_v31  ;;  %v329_v48 = vrot.slane %v328_v39, 4  ;;  %v340_v28 = vld [vmem:[#allocation3 + $0x28] sm:$0xff]  ;;  %v341_v35 = vld [vmem:[#allocation3 + $0x30] sm:$0xff] }
  0x5b   :  { %v303_v45 = vrot.slane %v302_v36, 2  ;;  %v284_v49 = vrot.slane %v283_v40, 1  ;;  %v290_v50 = vadd.f32 %v289_v41, %v288_v33  ;;  %v1077_v53 = vadd.f32 %v296_v43, %v295_v34 }
  0x5c   :  { %v317_v51 = vrot.slane %v316_v44, 2  ;;  %v1081_v55 = vadd.f32 %v310_v46, %v309_v37  ;;  %v330_v56 = vadd.f32 %v329_v48, %v328_v39  ;;  %v324_v59 = vrot.slane %v323_v47, 2 }
  0x5d   :  { %v1079_v54 = vadd.f32 %v303_v45, %v302_v36  ;;  %v429_v60 = vrot.slane %v1038_v8, 3  ;;  %v430_v61 = vrot.slane %v1038_v8, 4  ;;  %v431_v1 = vrot.slane %v1038_v8, 5 }
  0x5e   :  { %v291_v6 = vrot.slane %v290_v50, 1  ;;  %v1086_v11 = vadd.f32 %v317_v51, %v316_v44  ;;  %v432_v14 = vrot.slane %v1038_v8, 6  ;;  %v433_v17 = vrot.slane %v1038_v8, 7  ;;  %v342_v44 = vld [vmem:[#allocation3 + $0x38] sm:$0xff] }
  0x5f   :  { %v1090_v18 = vadd.f32 %v284_v49, %v283_v40  ;;  %v343_v20 = vsel %vm1286_vm1, %v335_v57, 0.0  ;;  %v298_v23 = vrot.slane %v1077_v53, 1  ;;  %v305_v24 = vrot.slane %v1079_v54, 1 }
  0x60   :  { %v312_v25 = vrot.slane %v1081_v55, 1  ;;  %v331_v26 = vrot.slane %v330_v56, 2  ;;  %v325_v29 = vadd.f32 %v324_v59, %v323_v47  ;;  %v344_v30 = vrot.slane %v343_v20, 4 }
  0x61   :  { %v350_v31 = vsel %vm1286_vm1, %v336_v12, 0.0  ;;  %v357_v32 = vsel %vm1286_vm1, %v337_v13, 0.0  ;;  %v292_v33 = vadd.f32 %v291_v6, %v290_v50  ;;  %v319_v34 = vrot.slane %v1086_v11, 1 }
  0x62   :  { %v351_v36 = vrot.slane %v350_v31, 4  ;;  %v358_v37 = vrot.slane %v357_v32, 4  ;;  %v345_v38 = vadd.f32 %v344_v30, %v343_v20  ;;  %v364_v39 = vsel %vm1286_vm1, %v338_v19, 0.0 }
  0x63   :  { %v371_v40 = vsel %vm1286_vm1, %v339_v27, 0.0  ;;  %v378_v41 = vsel %vm1286_vm1, %v340_v28, 0.0  ;;  %v332_v43 = vadd.f32 %v331_v26, %v330_v56  ;;  %v365_v47 = vrot.slane %v364_v39, 4 }
  0x64   :  { %v352_v45 = vadd.f32 %v351_v36, %v350_v31  ;;  %v359_v46 = vadd.f32 %v358_v37, %v357_v32  ;;  %v346_v48 = vrot.slane %v345_v38, 2  ;;  %v372_v49 = vrot.slane %v371_v40, 4 }
  0x65   :  { %v379_v50 = vrot.slane %v378_v41, 4  ;;  %v385_v51 = vsel %vm1286_vm1, %v341_v35, 0.0  ;;  %v366_v6 = vadd.f32 %v365_v47, %v364_v39  ;;  %v392_v27 = vsel %vm1286_vm1, %v342_v44, 0.0 }
  0x66   :  { %v353_v57 = vrot.slane %v352_v45, 2  ;;  %v360_v59 = vrot.slane %v359_v46, 2  ;;  %v386_v12 = vrot.slane %v385_v51, 4  ;;  %v347_v13 = vadd.f32 %v346_v48, %v345_v38 }
  0x67   :  { %v373_v19 = vadd.f32 %v372_v49, %v371_v40  ;;  %v380_v20 = vadd.f32 %v379_v50, %v378_v41  ;;  %v326_v28 = vrot.slane %v325_v29, 1  ;;  %v333_v56 = vrot.slane %v332_v43, 1 }
  0x68   :  { %v367_v26 = vrot.slane %v366_v6, 2  ;;  %v387_v30 = vadd.f32 %v386_v12, %v385_v51  ;;  %v354_v31 = vadd.f32 %v353_v57, %v352_v45  ;;  %v393_v37 = vrot.slane %v392_v27, 4 }
  0x69   :  { %v374_v32 = vrot.slane %v373_v19, 2  ;;  %v381_v36 = vrot.slane %v380_v20, 2  ;;  %v348_v22 = vrot.slane %v347_v13, 1  ;;  %v361_v21 = vadd.f32 %v360_v59, %v359_v46 }
  0x6a   :  { %v368_v35 = vadd.f32 %v367_v26, %v366_v6  ;;  %v388_v5 = vrot.slane %v387_v30, 2  ;;  %v299_v39 = vadd.f32 %v298_v23, %v1077_v53  ;;  %v394_v40 = vadd.f32 %v393_v37, %v392_v27 }
  0x6b   :  { %v375_v47 = vadd.f32 %v374_v32, %v373_v19  ;;  %v382_v38 = vadd.f32 %v381_v36, %v380_v20  ;;  %v306_v41 = vadd.f32 %v305_v24, %v1079_v54  ;;  %v313_v44 = vadd.f32 %v312_v25, %v1081_v55 }
  0x6c   :  { %v320_v48 = vadd.f32 %v319_v34, %v1086_v11  ;;  %v389_v49 = vadd.f32 %v388_v5, %v387_v30  ;;  %v327_v45 = vadd.f32 %v326_v28, %v325_v29  ;;  %v334_v50 = vadd.f32 %v333_v56, %v332_v43 }
  0x6d   :  { %v355_v51 = vrot.slane %v354_v31, 1  ;;  %v395_v57 = vrot.slane %v394_v40, 2  ;;  %v349_v12 = vadd.f32 %v348_v22, %v347_v13  ;;  %v362_v46 = vrot.slane %v361_v21, 1 }
  0x6e   :  { %v369_v59 = vrot.slane %v368_v35, 1  ;;  %v376_v6 = vrot.slane %v375_v47, 1  ;;  %v383_v26 = vrot.slane %v382_v38, 1  ;;  %v390_v53 = vrot.slane %v389_v49, 1 }
  0x6f   :  { %v396_v23 = vadd.f32 %v395_v57, %v394_v40  ;;  %v416_v19 = vadd.f32 %v1036_v58, %v1090_v18  ;;  %v417_v54 = vadd.f32 %v401_v2, %v292_v33  ;;  %v418_v5 = vadd.f32 %v402_v3, %v299_v39 }
  0x70   :  { %v419_v55 = vadd.f32 %v403_v4, %v306_v41  ;;  %v420_v11 = vadd.f32 %v404_v7, %v313_v44  ;;  %v421_v24 = vadd.f32 %v405_v9, %v320_v48  ;;  %v422_v25 = vadd.f32 %v406_v10, %v327_v45 }
  0x71   :  { %v397_v22 = vrot.slane %v396_v23, 1  ;;  %v423_v18 = vadd.f32 %v407_v15, %v334_v50  ;;  %v356_v2 = vadd.f32 %v355_v51, %v354_v31  ;;  %v363_v29 = vadd.f32 %v362_v46, %v361_v21 }
  0x72   :  { %v370_v33 = vadd.f32 %v369_v59, %v368_v35  ;;  %v377_v3 = vadd.f32 %v376_v6, %v375_v47  ;;  %v384_v34 = vadd.f32 %v383_v26, %v382_v38  ;;  %v391_v43 = vadd.f32 %v390_v53, %v389_v49 }
  0x73   :  { %v398_v4 = vadd.f32 %v397_v22, %v396_v23  ;;  %v450_v13 = vmul.f32 0.125, %v416_v19  ;;  %v451_v20 = vmul.f32 0.125, %v417_v54  ;;  %v452_v7 = vmul.f32 0.125, %v418_v5 }
  0x74   :  { %v453_v27 = vmul.f32 0.125, %v419_v55  ;;  %v454_v28 = vmul.f32 0.125, %v420_v11  ;;  %v442_v9 = vsub.f32 %v349_v12, %v1038_v8  ;;  %v455_v56 = vmul.f32 0.125, %v421_v24 }
  0x75   :  { %v456_v30 = vmul.f32 0.125, %v422_v25  ;;  %v457_v10 = vmul.f32 0.125, %v423_v18  ;;  %v443_v58 = vsub.f32 %v356_v2, %v427_v16  ;;  %v444_v15 = vsub.f32 %v363_v29, %v428_v52 }
  0x76   :  { %v445_v21 = vsub.f32 %v370_v33, %v429_v60  ;;  %v446_v31 = vsub.f32 %v377_v3, %v430_v61  ;;  %v447_v32 = vsub.f32 %v384_v34, %v431_v1  ;;  %v448_v36 = vsub.f32 %v391_v43, %v432_v14 }
  0x77   :  { %v449_v37 = vsub.f32 %v398_v4, %v433_v17  ;;  %v482_v35 = vmul.f32 %v450_v13, %v450_v13  ;;  %v483_v16 = vmul.f32 %v451_v20, %v451_v20  ;;  %v484_v39 = vmul.f32 %v452_v7, %v452_v7 }
  0x78   :  { %v485_v47 = vmul.f32 %v453_v27, %v453_v27  ;;  %v486_v52 = vmul.f32 %v454_v28, %v454_v28  ;;  %v487_v38 = vmul.f32 %v455_v56, %v455_v56  ;;  %v488_v40 = vmul.f32 %v456_v30, %v456_v30 }
  0x79   :  { %v489_v60 = vmul.f32 %v457_v10, %v457_v10  ;;  %v490_v41 = vmul.f32 8.0, %v482_v35  ;;  %v491_v44 = vmul.f32 8.0, %v483_v16  ;;  %v492_v61 = vmul.f32 8.0, %v484_v39 }
  0x7a   :  { %v493_v48 = vmul.f32 8.0, %v485_v47  ;;  %v494_v49 = vmul.f32 8.0, %v486_v52  ;;  %v495_v1 = vmul.f32 8.0, %v487_v38  ;;  %v496_v45 = vmul.f32 8.0, %v488_v40 }
  0x7b   :  { %v497_v50 = vmul.f32 8.0, %v489_v60  ;;  %v498_v14 = vsub.f32 %v442_v9, %v490_v41  ;;  %v465_v8 = vrot.slane %v1028_v42, 7  ;;  %v499_v17 = vsub.f32 %v443_v58, %v491_v44 }
  0x7c   :  { %v500_v51 = vsub.f32 %v444_v15, %v492_v61  ;;  %v501_v57 = vsub.f32 %v445_v21, %v493_v48  ;;  %v475_v12 = vadd.f32 %v459_v62, %v451_v20  ;;  %v502_v46 = vsub.f32 %v446_v31, %v494_v49 }
  0x7d   :  { %v503_v59 = vsub.f32 %v447_v32, %v495_v1  ;;  %v506_v6 = vmul.f32 0.14285715, %v498_v14  ;;  %v476_v26 = vadd.f32 %v460_v63, %v452_v7  ;;  %v477_v53 = vadd.f32 %v461_v0, %v453_v27 }
  0x7e   :  { %v507_v23 = vmul.f32 0.14285715, %v499_v17  ;;  %v508_v19 = vmul.f32 0.14285715, %v500_v51  ;;  %v474_v54 = vadd.f32 %v450_v13, %v1028_v42  ;;  %v1292_v5 = vrot.slane %v1028_v42, 4 }
  0x7f   :  { %v504_v11 = vsub.f32 %v448_v36, %v496_v45  ;;  %v505_v22 = vsub.f32 %v449_v37, %v497_v50  ;;  %v1293_v62 = vrot.slane %v1028_v42, 5  ;;  %v1294_v25 = vrot.slane %v1028_v42, 6 }
  0x80   :  { %v478_v55 = vadd.f32 %v1292_v5, %v454_v28  ;;  %v509_v2 = vmul.f32 0.14285715, %v501_v57  ;;  %v1155_v63 = vmax.f32 %v506_v6, 0.0  ;;  %v481_v29 = vadd.f32 %v465_v8, %v457_v10 }
  0x81   :  { %v479_v24 = vadd.f32 %v1293_v62, %v455_v56  ;;  %v480_v18 = vadd.f32 %v1294_v25, %v456_v30  ;;  %v510_v0 = vmul.f32 0.14285715, %v502_v46  ;;  %v511_v33 = vmul.f32 0.14285715, %v503_v59 }
  0x82   :  { %v1157_v3 = vmax.f32 %v507_v23, 0.0  ;;  %v1159_v34 = vmax.f32 %v508_v19, 0.0  ;;  %v695_v43 = vrot.slane %v475_v12, 7  ;;  %v697_v4 = vrot.slane %v476_v26, 6 }
  0x83   :  { %v699_v13 = vrot.slane %v477_v53, 5  ;;  %v512_v20 = vmul.f32 0.14285715, %v504_v11  ;;  %v513_v7 = vmul.f32 0.14285715, %v505_v22  ;;  %v701_v27 = vrot.slane %v478_v55, 4 }
  0x84   :  { %v1161_v28 = vmax.f32 %v509_v2, 0.0  ;;  %v696_v42 = vsel %vm64_vm2, %v695_v43, %v474_v54  ;;  %v703_v9 = vrot.slane %v479_v24, 3  ;;  %863 = vrsqrt.f32 %v1155_v63 }
  0x85   :  { %v1165_v56 = vmax.f32 %v510_v0, 0.0  ;;  %v698_v30 = vsel %vm67_vm3, %v697_v4, %v696_v42  ;;  %v705_v10 = vrot.slane %v480_v18, 2  ;;  %865 = vrsqrt.f32 %v1157_v3 }
  0x86   :  { %v1169_v58 = vmax.f32 %v511_v33, 0.0  ;;  %v700_v15 = vsel %vm1291_vm4, %v699_v13, %v698_v30  ;;  %v707_v21 = vrot.slane %v481_v29, 1  ;;  %867 = vrsqrt.f32 %v1159_v34 }
  0x87   :  { %v1173_v31 = vmax.f32 %v512_v20, 0.0  ;;  %v702_v32 = vsel %vm1290_vm5, %v701_v27, %v700_v15  ;;  %v1176_v36 = vmax.f32 %v513_v7, 0.0  ;;  %869 = vrsqrt.f32 %v1161_v28 }
  0x88   :  { %v704_v37 = vsel %vm1289_vm6, %v703_v9, %v702_v32  ;;  %871 = vrsqrt.f32 %v1165_v56  ;;  %vm524_vm9 = vcmp.eq.f32.partialorder %v1155_v63, inf  ;;  %vm526_vm10 = vcmp.eq.f32.partialorder %v1155_v63, 0.0 }
  0x89   :  { %v706_v35 = vsel %vm1288_vm7, %v705_v10, %v704_v37  ;;  %873 = vrsqrt.f32 %v1169_v58  ;;  %v527_v39 = vand.u32 2147483648, %v1155_v63  ;;  %vm531_vm11 = vcmp.eq.f32.partialorder %v1157_v3, inf }
  0x8a   :  { %v708_v16 = vsel %vm1287_vm8, %v707_v21, %v706_v35  ;;  %875 = vrsqrt.f32 %v1173_v31  ;;  %vm533_vm12 = vcmp.eq.f32.partialorder %v1157_v3, 0.0  ;;  %v534_v47 = vand.u32 2147483648, %v1157_v3  ;;  %v808_v21 = vld [vmem:[%s1284_s2] ss:$0 sm:$0xff] }
  0x8b   :  { %839 = vmatmul.mubr.msk.f32.vlgmr.msra.gmra.mrb[0].mxu1 %vm1286_vm1, %v708_v16  ;;  %877 = vrsqrt.f32 %v1176_v36  ;;  %vm538_vm13 = vcmp.eq.f32.partialorder %v1159_v34, inf  ;;  %vm540_vm14 = vcmp.eq.f32.partialorder %v1159_v34, 0.0  ;;  %v541_v38 = vand.u32 2147483648, %v1159_v34 }
  0x8c   :  { %vm545_vm15 = vcmp.eq.f32.partialorder %v1161_v28, inf  ;;  %vm547_vm0 = vcmp.eq.f32.partialorder %v1161_v28, 0.0  ;;  %v548_v41 = vand.u32 2147483648, %v1161_v28  ;;  %vm552_vm1 = vcmp.eq.f32.partialorder %v1165_v56, inf }
  0x8d   :  { %vm554_vm8 = vcmp.eq.f32.partialorder %v1165_v56, 0.0  ;;  %v555_v48 = vand.u32 2147483648, %v1165_v56  ;;  %vm559_vm7 = vcmp.eq.f32.partialorder %v1169_v58, inf  ;;  %v562_v45 = vand.u32 2147483648, %v1169_v58 }
  0x8e   :  { %v864_v52 = vpop.eup %863  ;;  %vm566_vm5 = vcmp.eq.f32.partialorder %v1173_v31, inf  ;;  %vm568_vm4 = vcmp.eq.f32.partialorder %v1173_v31, 0.0  ;;  %v569_v8 = vand.u32 2147483648, %v1173_v31  ;;  %vm573_vm6 = vcmp.eq.f32.partialorder %v1176_v36, inf }
  0x8f   :  { %v866_v40 = vpop.eup %865  ;;  %v523_v60 = vmul.f32 %v864_v52, %v1155_v63  ;;  %v576_v5 = vand.u32 2147483648, %v1176_v36 }
  0x90   :  { %v868_v44 = vpop.eup %867  ;;  %v530_v61 = vmul.f32 %v866_v40, %v1157_v3 }
  0x91   :  { %v525_v49 = vsel %vm524_vm9, %v1155_v63, %v523_v60  ;;  %v537_v1 = vmul.f32 %v868_v44, %v1159_v34  ;;  %v870_v50 = vpop.eup %869  ;;  %vm575_vm9 = vcmp.eq.f32.partialorder %v1176_v36, 0.0 }
  0x92   :  { %v532_v14 = vsel %vm531_vm11, %v1157_v3, %v530_v61  ;;  %v872_v17 = vpop.eup %871  ;;  %v528_v51 = vsel %vm526_vm10, %v527_v39, %v525_v49  ;;  %v544_v46 = vmul.f32 %v870_v50, %v1161_v28  ;;  %vm1295_vm10 = vcmp.eq.f32.partialorder %v1169_v58, 0.0 }
  0x93   :  { %v535_v57 = vsel %vm533_vm12, %v534_v47, %v532_v14  ;;  %v539_v12 = vsel %vm538_vm13, %v1159_v34, %v537_v1  ;;  %v874_v59 = vpop.eup %873  ;;  %v551_v26 = vmul.f32 %v872_v17, %v1165_v56 }
  0x94   :  { %v542_v6 = vsel %vm540_vm14, %v541_v38, %v539_v12  ;;  %v594_v53 = vrot.slane %v535_v57, 7  ;;  %v876_v23 = vpop.eup %875  ;;  %v546_v19 = vsel %vm545_vm15, %v1161_v28, %v544_v46  ;;  %v558_v54 = vmul.f32 %v874_v59, %v1169_v58 }
  0x95   :  { %v597_v55 = vrot.slane %v542_v6, 6  ;;  %v878_v11 = vpop.eup %877  ;;  %v549_v22 = vsel %vm547_vm0, %v548_v41, %v546_v19  ;;  %v553_v62 = vsel %vm552_vm1, %v1165_v56, %v551_v26  ;;  %v565_v24 = vmul.f32 %v876_v23, %v1173_v31 }
  0x96   :  { %v596_v25 = vsel %vm64_vm2, %v594_v53, %v528_v51  ;;  %v556_v18 = vsel %vm554_vm8, %v555_v48, %v553_v62  ;;  %v560_v2 = vsel %vm559_vm7, %v1169_v58, %v558_v54  ;;  %v572_v63 = vmul.f32 %v878_v11, %v1176_v36 }
  0x97   :  { %v599_v29 = vsel %vm67_vm3, %v597_v55, %v596_v25  ;;  %v563_v0 = vsel %vm1295_vm10, %v562_v45, %v560_v2  ;;  %v567_v33 = vsel %vm566_vm5, %v1173_v31, %v565_v24  ;;  %v600_v3 = vrot.slane %v549_v22, 5 }
  0x98   :  { %v603_v34 = vrot.slane %v556_v18, 4  ;;  %v570_v43 = vsel %vm568_vm4, %v569_v8, %v567_v33  ;;  %v574_v4 = vsel %vm573_vm6, %v1176_v36, %v572_v63  ;;  %v606_v13 = vrot.slane %v563_v0, 3 }
  0x99   :  { %v577_v20 = vsel %vm575_vm9, %v576_v5, %v574_v4  ;;  %vm1296_vm1 = vcmask 1043459   ;;  %v609_v27 = vrot.slane %v570_v43, 2  ;;  %vm1297_vm2 = vcmask 1044484  }
  0x9a   :  { %v602_v7 = vsel %vm1296_vm1, %v600_v3, %v599_v29  ;;  %v612_v42 = vrot.slane %v577_v20, 1  ;;  %vm1298_vm3 = vcmask 1045509   ;;  %vm1299_vm5 = vcmask 1046534  }
  0x9b   :  { %v605_v28 = vsel %vm1297_vm2, %v603_v34, %v602_v7  ;;  %vm1300_vm7 = vcmask 1047559   ;;  %vm1301_vm4 = vcmask 261120  }
  0x9c   :  { %v608_v9 = vsel %vm1298_vm3, %v606_v13, %v605_v28 }
  0x9d   :  { %v611_v56 = vsel %vm1299_vm5, %v609_v27, %v608_v9 }
  0x9e   :  { %v614_v30 = vsel %vm1300_vm7, %v612_v42, %v611_v56 }
  0x9f   :  { %828 = vmatmul.mubr.msk.f32.vlgmr.msra.gmra.mrb[0].mxu0 %vm1301_vm4, %v614_v30 }
 0x15e   :  { %v777_v10 = vpop.f32.mrb[0].mxu1 }
 0x15f   :  { %v840_v58 = vpop.f32.mrb[1].mxu1 }
 0x172   :  { %v683_v15 = vpop.f32.mrb[0].mxu0 }
 0x173   :  { %v778_v31 = vadd.f32 %v777_v10, %v683_v15  ;;  %v829_v32 = vpop.f32.mrb[1].mxu0 }
 0x175   :  { %v788_v36 = vadd.f32 %v808_v21, %v778_v31 }
 0x177   :  { %789 = vst [vmem:[#allocation10] sm:$0xff] %v788_v36 }
 0x178   :  { %934 = shalt.err (!%p931_p6)
}
 0x179   :  { %s935_s16 = scalar_lea.hbm %s1285_s3, 128 }
 0x17a   :  { %p936_p7 = scmp.ne.s32.totalorder %s1285_s3, %s935_s16  ;;  %p939_p8 = scmp.lt.u32.totalorder %s935_s16, %s1285_s3 }
 0x17c   :  { %p941_p9 = pnand %p939_p8, %p936_p7 }
 0x17e   :  { %944 = shalt.err (!%p941_p9)
}
 0x17f   :  { %799 = dma.vmem_to_hbm [thread:$0]  %s797_s12, 128, %s1285_s3, [#allocation7]  }
 0x180   :  { %949 = dma.done.wait [#allocation7], 128  }
 0x181   :  { %950 = vsyncadd [#allocation7], 4294967168 }
 0x182   :  { %803 = vsyncpa [#allocation6], 1 }
 0x183   :  { %804 = vsyncpa [#allocation9], 1 }
 0x184   :  { %805 = vsyncpa [#allocation7], 1 }

</bundles_post_ra>
